<compile_context>
chip_gen: v7x
topology: tpu7x:2x2x1
jax: 0.10.0
libtpu: 0.0.40
codegen_flags: <defaults>
</compile_context>

<pallas_src>
import math

import jax
import jax.numpy as jnp
from jax.experimental import pallas as pl
from jax.experimental.pallas import tpu as pltpu

Z_DIM = 64
HIDDEN = 512
OUT_LANES = 128  # lane-dense packed output width


def _disc_z_kernel(z_ref,
                   w1_ref, b1_ref,
                   w2_ref, b2_ref,
                   w3_ref, b3_ref,
                   w4_ref, b4_ref,
                   out_ref):
    # (TB, 64) bf16 activations x bf16 weights, f32 accumulation on the MXU.
    z = z_ref[...]

    h1 = jnp.dot(z, w1_ref[...], preferred_element_type=jnp.float32) + b1_ref[...]
    h1 = jnp.maximum(h1, 0.0).astype(jnp.bfloat16)

    h2 = jnp.dot(h1, w2_ref[...], preferred_element_type=jnp.float32) + b2_ref[...]
    h2 = jnp.maximum(h2, 0.0).astype(jnp.bfloat16)

    h3 = jnp.dot(h2, w3_ref[...], preferred_element_type=jnp.float32) + b3_ref[...]
    h3 = jnp.maximum(h3, 0.0)  # keep f32: last layer is a VPU mul + lane reduce

    # fc4 (512 -> 1): VPU multiply + XLU lane reduction instead of an N=1 MXU pass.
    w4 = w4_ref[...].astype(jnp.float32)                              # (1, 512)
    logit = jnp.sum(h3 * w4, axis=-1, keepdims=True) + b4_ref[0, 0]   # (TB, 1)
    prob = jax.nn.sigmoid(logit)

    # Pack both results into one lane-dense slab: lane 0 = logit, lanes 1.. = prob.
    lane = jax.lax.broadcasted_iota(jnp.int32, out_ref.shape, 1)
    out_ref[...] = jnp.where(lane == 0, logit, prob).astype(out_ref.dtype)


def discriminator_z_forward(z, params):
    """Fused DiscriminatorZ forward pass. Returns (d_prob, d_logit), each (B, 1)."""
    w1, b1, w2, b2, w3, b3, w4_row, b4 = params
    B = z.shape[0]

    # Batch tile: 256 rows fills the 256-row MXU on v6e/v7x; tiny batches are
    # rounded up to a multiple of 8 sublanes instead of being padded to 256.
    if B >= 256:
        tb = 256
    else:
        tb = max(8, ((B + 7) // 8) * 8)
    bp = ((B + tb - 1) // tb) * tb

    zb = z.astype(jnp.bfloat16)
    if bp != B:
        zb = jnp.pad(zb, ((0, bp - B), (0, 0)))

    grid = (bp // tb,)
    const = lambda i: (0, 0)  # weights/biases stay VMEM-resident across batch tiles

    out = pl.pallas_call(
        _disc_z_kernel,
        out_shape=jax.ShapeDtypeStruct((bp, OUT_LANES), jnp.float32),
        grid=grid,
        in_specs=[
            pl.BlockSpec((tb, Z_DIM), lambda i: (i, 0)),        # z batch tile
            pl.BlockSpec((Z_DIM, HIDDEN), const),               # w1 (bf16)
            pl.BlockSpec((1, HIDDEN), const),                   # b1 (f32)
            pl.BlockSpec((HIDDEN, HIDDEN), const),              # w2 (bf16)
            pl.BlockSpec((1, HIDDEN), const),                   # b2 (f32)
            pl.BlockSpec((HIDDEN, HIDDEN), const),              # w3 (bf16)
            pl.BlockSpec((1, HIDDEN), const),                   # b3 (f32)
            pl.BlockSpec((1, HIDDEN), const),                   # w4 row (bf16)
            pl.BlockSpec(memory_space=pltpu.MemorySpace.SMEM),  # b4 scalar (f32)
        ],
        out_specs=pl.BlockSpec((tb, OUT_LANES), lambda i: (i, 0)),
        compiler_params=pltpu.CompilerParams(
            dimension_semantics=("parallel",),        # megacore split on v7x
            vmem_limit_bytes=32 * 1024 * 1024,        # explicit budget (footprint ~2 MiB)
        ),
    )(zb, w1, b1, w2, b2, w3, b3, w4_row, b4)

    logit = out[:B, 0:1]
    prob = out[:B, 1:2]
    return prob, logit


def init_params(key):
    """PyTorch-style Linear init: U(-1/sqrt(fan_in), 1/sqrt(fan_in)).

    Weights are stored as (in, out) in bf16 (fc4 as a (1, 512) row for the VPU
    reduction); biases are f32 rows, fc4's bias is a (1, 1) SMEM scalar.
    """
    def linear(k, fan_in, fan_out):
        kw, kb = jax.random.split(k)
        bound = 1.0 / math.sqrt(fan_in)
        w = jax.random.uniform(kw, (fan_in, fan_out), jnp.float32, -bound, bound)
        b = jax.random.uniform(kb, (1, fan_out), jnp.float32, -bound, bound)
        return w, b

    k1, k2, k3, k4 = jax.random.split(key, 4)
    w1, b1 = linear(k1, Z_DIM, HIDDEN)
    w2, b2 = linear(k2, HIDDEN, HIDDEN)
    w3, b3 = linear(k3, HIDDEN, HIDDEN)
    w4, b4 = linear(k4, HIDDEN, 1)       # w4: (512, 1), b4: (1, 1)

    bf = jnp.bfloat16
    return (w1.astype(bf), b1,
            w2.astype(bf), b2,
            w3.astype(bf), b3,
            w4.T.astype(bf),             # (1, 512) row layout
            b4)


def _reference_forward(z, params):
    """Pure-JAX f32 reference (weights up-cast from their stored bf16)."""
    w1, b1, w2, b2, w3, b3, w4_row, b4 = params
    f32 = lambda a: a.astype(jnp.float32)
    h1 = jax.nn.relu(z @ f32(w1) + b1)
    h2 = jax.nn.relu(h1 @ f32(w2) + b2)
    h3 = jax.nn.relu(h2 @ f32(w3) + b3)
    logit = h3 @ f32(w4_row).T + b4
    return jax.nn.sigmoid(logit), logit


if __name__ == "__main__":
    key = jax.random.PRNGKey(0)
    key, zkey = jax.random.split(key)

    B = 8  # small batch
    z = jax.random.normal(zkey, (B, Z_DIM), jnp.float32)
    params = init_params(key)

    prob, logit = discriminator_z_forward(z, params)
    jax.block_until_ready((prob, logit))

    # sanity check against pure-JAX reference (bf16 weights -> loose tolerance)
    ref_prob, ref_logit = _reference_forward(z, params)
    assert prob.shape == (B, 1) and logit.shape == (B, 1)
    assert jnp.allclose(logit, ref_logit, atol=2e-2, rtol=2e-2), (
        float(jnp.max(jnp.abs(logit - ref_logit))))
    assert jnp.allclose(prob, ref_prob, atol=1e-2, rtol=1e-2)

    print("KERNEL_OK")
</pallas_src>

<mosaic_0001>
module attributes {stable_mosaic.version = 11 : i64} {
  func.func @_disc_z_kernel(%arg0: i32, %arg1: memref<8x64xbf16, #tpu.memory_space<vmem>>, %arg2: memref<64x512xbf16, #tpu.memory_space<vmem>>, %arg3: memref<1x512xf32, #tpu.memory_space<vmem>>, %arg4: memref<512x512xbf16, #tpu.memory_space<vmem>>, %arg5: memref<1x512xf32, #tpu.memory_space<vmem>>, %arg6: memref<512x512xbf16, #tpu.memory_space<vmem>>, %arg7: memref<1x512xf32, #tpu.memory_space<vmem>>, %arg8: memref<1x512xbf16, #tpu.memory_space<vmem>>, %arg9: memref<1x1xf32, #tpu.memory_space<smem>>, %arg10: memref<8x128xf32, #tpu.memory_space<vmem>>) attributes {dimension_semantics = [#tpu.dimension_semantics<parallel>], iteration_bounds = array<i64: 1>, scalar_prefetch = 0 : i64, scratch_operands = 0 : i64, tpu.core_type = #tpu.core_type<tc>, window_params = [{transform_indices = @transform_0, window_bounds = array<i64: 8, 64>}, {pipeline_mode = #tpu.pipeline_mode<synchronous>, transform_indices = @transform_1, window_bounds = array<i64: 64, 512>}, {pipeline_mode = #tpu.pipeline_mode<synchronous>, transform_indices = @transform_2, window_bounds = array<i64: 1, 512>}, {pipeline_mode = #tpu.pipeline_mode<synchronous>, transform_indices = @transform_3, window_bounds = array<i64: 512, 512>}, {pipeline_mode = #tpu.pipeline_mode<synchronous>, transform_indices = @transform_4, window_bounds = array<i64: 1, 512>}, {pipeline_mode = #tpu.pipeline_mode<synchronous>, transform_indices = @transform_5, window_bounds = array<i64: 512, 512>}, {pipeline_mode = #tpu.pipeline_mode<synchronous>, transform_indices = @transform_6, window_bounds = array<i64: 1, 512>}, {pipeline_mode = #tpu.pipeline_mode<synchronous>, transform_indices = @transform_7, window_bounds = array<i64: 1, 512>}, {transform_indices = @transform_8, window_bounds = array<i64: 1, 1>}, {transform_indices = @transform_9, window_bounds = array<i64: 8, 128>}]} {
    %c0 = arith.constant 0 : index
    %c0_0 = arith.constant 0 : index
    %0 = vector.load %arg1[%c0, %c0_0] : memref<8x64xbf16, #tpu.memory_space<vmem>>, vector<8x64xbf16>
    %c0_1 = arith.constant 0 : index
    %c0_2 = arith.constant 0 : index
    %1 = vector.load %arg2[%c0_1, %c0_2] : memref<64x512xbf16, #tpu.memory_space<vmem>>, vector<64x512xbf16>
    %cst = arith.constant dense<0.000000e+00> : vector<8x512xf32>
    %2 = tpu.matmul %0, %1, %cst {dimension_numbers = #tpu.dot_dimension_numbers<[1], [0], [0], [1], [0, 0, 1, 1], [], []>} : vector<8x64xbf16>, vector<64x512xbf16>, vector<8x512xf32> -> vector<8x512xf32>
    %c0_3 = arith.constant 0 : index
    %c0_4 = arith.constant 0 : index
    %3 = vector.load %arg3[%c0_3, %c0_4] : memref<1x512xf32, #tpu.memory_space<vmem>>, vector<1x512xf32>
    %4 = vector.broadcast %3 : vector<1x512xf32> to vector<8x512xf32>
    %5 = arith.addf %2, %4 : vector<8x512xf32>
    %cst_5 = arith.constant 0.000000e+00 : f32
    %6 = vector.broadcast %cst_5 : f32 to vector<8x512xf32>
    %7 = arith.maximumf %5, %6 : vector<8x512xf32>
    %8 = arith.truncf %7 : vector<8x512xf32> to vector<8x512xbf16>
    %c0_6 = arith.constant 0 : index
    %c0_7 = arith.constant 0 : index
    %9 = vector.load %arg4[%c0_6, %c0_7] : memref<512x512xbf16, #tpu.memory_space<vmem>>, vector<512x512xbf16>
    %cst_8 = arith.constant dense<0.000000e+00> : vector<8x512xf32>
    %10 = tpu.matmul %8, %9, %cst_8 {dimension_numbers = #tpu.dot_dimension_numbers<[1], [0], [0], [1], [0, 0, 1, 1], [], []>} : vector<8x512xbf16>, vector<512x512xbf16>, vector<8x512xf32> -> vector<8x512xf32>
    %c0_9 = arith.constant 0 : index
    %c0_10 = arith.constant 0 : index
    %11 = vector.load %arg5[%c0_9, %c0_10] : memref<1x512xf32, #tpu.memory_space<vmem>>, vector<1x512xf32>
    %12 = vector.broadcast %11 : vector<1x512xf32> to vector<8x512xf32>
    %13 = arith.addf %10, %12 : vector<8x512xf32>
    %cst_11 = arith.constant 0.000000e+00 : f32
    %14 = vector.broadcast %cst_11 : f32 to vector<8x512xf32>
    %15 = arith.maximumf %13, %14 : vector<8x512xf32>
    %16 = arith.truncf %15 : vector<8x512xf32> to vector<8x512xbf16>
    %c0_12 = arith.constant 0 : index
    %c0_13 = arith.constant 0 : index
    %17 = vector.load %arg6[%c0_12, %c0_13] : memref<512x512xbf16, #tpu.memory_space<vmem>>, vector<512x512xbf16>
    %cst_14 = arith.constant dense<0.000000e+00> : vector<8x512xf32>
    %18 = tpu.matmul %16, %17, %cst_14 {dimension_numbers = #tpu.dot_dimension_numbers<[1], [0], [0], [1], [0, 0, 1, 1], [], []>} : vector<8x512xbf16>, vector<512x512xbf16>, vector<8x512xf32> -> vector<8x512xf32>
    %c0_15 = arith.constant 0 : index
    %c0_16 = arith.constant 0 : index
    %19 = vector.load %arg7[%c0_15, %c0_16] : memref<1x512xf32, #tpu.memory_space<vmem>>, vector<1x512xf32>
    %20 = vector.broadcast %19 : vector<1x512xf32> to vector<8x512xf32>
    %21 = arith.addf %18, %20 : vector<8x512xf32>
    %cst_17 = arith.constant 0.000000e+00 : f32
    %22 = vector.broadcast %cst_17 : f32 to vector<8x512xf32>
    %23 = arith.maximumf %21, %22 : vector<8x512xf32>
    %c0_18 = arith.constant 0 : index
    %c0_19 = arith.constant 0 : index
    %24 = vector.load %arg8[%c0_18, %c0_19] : memref<1x512xbf16, #tpu.memory_space<vmem>>, vector<1x512xbf16>
    %25 = arith.extf %24 : vector<1x512xbf16> to vector<1x512xf32>
    %26 = vector.broadcast %25 : vector<1x512xf32> to vector<8x512xf32>
    %27 = arith.mulf %23, %26 : vector<8x512xf32>
    %cst_20 = arith.constant dense<0.000000e+00> : vector<8xf32>
    %28 = vector.multi_reduction <add>, %27, %cst_20 [1] : vector<8x512xf32> to vector<8xf32>
    %29 = vector.shape_cast %28 : vector<8xf32> to vector<8x1xf32>
    %c0_21 = arith.constant 0 : index
    %c0_22 = arith.constant 0 : index
    %30 = memref.load %arg9[%c0_21, %c0_22] : memref<1x1xf32, #tpu.memory_space<smem>>
    %31 = vector.broadcast %30 : f32 to vector<8x1xf32>
    %32 = arith.addf %29, %31 : vector<8x1xf32>
    %33 = arith.negf %32 : vector<8x1xf32>
    %34 = math.exp %33 : vector<8x1xf32>
    %cst_23 = arith.constant 1.000000e+00 : f32
    %35 = vector.broadcast %cst_23 : f32 to vector<8x1xf32>
    %36 = arith.addf %35, %34 : vector<8x1xf32>
    %37 = arith.divf %35, %36 : vector<8x1xf32>
    %38 = tpu.iota {dimensions = array<i32: 1>} : vector<8x128xi32>
    %c0_i32 = arith.constant 0 : i32
    %39 = vector.broadcast %c0_i32 : i32 to vector<8x128xi32>
    %40 = arith.cmpi eq, %38, %39 : vector<8x128xi32>
    %41 = vector.shape_cast %32 : vector<8x1xf32> to vector<8x1xf32>
    %42 = vector.broadcast %41 : vector<8x1xf32> to vector<8x128xf32>
    %43 = vector.shape_cast %37 : vector<8x1xf32> to vector<8x1xf32>
    %44 = vector.broadcast %43 : vector<8x1xf32> to vector<8x128xf32>
    %45 = arith.select %40, %42, %44 : vector<8x128xi1>, vector<8x128xf32>
    %c0_24 = arith.constant 0 : index
    %c0_25 = arith.constant 0 : index
    %46 = vector.load %arg10[%c0_24, %c0_25] : memref<8x128xf32, #tpu.memory_space<vmem>>, vector<8x128xf32>
    tpu.vector_store %arg10[%c0_24, %c0_25], %45 {strides = array<i32>} : memref<8x128xf32, #tpu.memory_space<vmem>>, vector<8x128xf32>,
    return
  }
  func.func @transform_0(%arg0: i32) -> (i32, i32) {
    %c0_i32 = arith.constant 0 : i32
    %c0_i32_0 = arith.constant 0 : i32
    return %arg0, %c0_i32 : i32, i32
  }
  func.func @transform_1(%arg0: i32) -> (i32, i32) {
    %c0_i32 = arith.constant 0 : i32
    %c0_i32_0 = arith.constant 0 : i32
    %c0_i32_1 = arith.constant 0 : i32
    return %c0_i32, %c0_i32_0 : i32, i32
  }
  func.func @transform_2(%arg0: i32) -> (i32, i32) {
    %c0_i32 = arith.constant 0 : i32
    %c0_i32_0 = arith.constant 0 : i32
    %c0_i32_1 = arith.constant 0 : i32
    return %c0_i32, %c0_i32_0 : i32, i32
  }
  func.func @transform_3(%arg0: i32) -> (i32, i32) {
    %c0_i32 = arith.constant 0 : i32
    %c0_i32_0 = arith.constant 0 : i32
    %c0_i32_1 = arith.constant 0 : i32
    return %c0_i32, %c0_i32_0 : i32, i32
  }
  func.func @transform_4(%arg0: i32) -> (i32, i32) {
    %c0_i32 = arith.constant 0 : i32
    %c0_i32_0 = arith.constant 0 : i32
    %c0_i32_1 = arith.constant 0 : i32
    return %c0_i32, %c0_i32_0 : i32, i32
  }
  func.func @transform_5(%arg0: i32) -> (i32, i32) {
    %c0_i32 = arith.constant 0 : i32
    %c0_i32_0 = arith.constant 0 : i32
    %c0_i32_1 = arith.constant 0 : i32
    return %c0_i32, %c0_i32_0 : i32, i32
  }
  func.func @transform_6(%arg0: i32) -> (i32, i32) {
    %c0_i32 = arith.constant 0 : i32
    %c0_i32_0 = arith.constant 0 : i32
    %c0_i32_1 = arith.constant 0 : i32
    return %c0_i32, %c0_i32_0 : i32, i32
  }
  func.func @transform_7(%arg0: i32) -> (i32, i32) {
    %c0_i32 = arith.constant 0 : i32
    %c0_i32_0 = arith.constant 0 : i32
    %c0_i32_1 = arith.constant 0 : i32
    return %c0_i32, %c0_i32_0 : i32, i32
  }
  func.func @transform_8(%arg0: i32) -> (i32, i32) {
    %c0_i32 = arith.constant 0 : i32
    %c0_i32_0 = arith.constant 0 : i32
    %c0_i32_1 = arith.constant 0 : i32
    return %c0_i32, %c0_i32_0 : i32, i32
  }
  func.func @transform_9(%arg0: i32) -> (i32, i32) {
    %c0_i32 = arith.constant 0 : i32
    %c0_i32_0 = arith.constant 0 : i32
    return %arg0, %c0_i32 : i32, i32
  }
}

</mosaic_0001>

<bundles_post_ra>
// kernel: tpu_custom_call.1
= control target key start
LH: loop header
LB: loop body
LE: loop exit
PB: predicated region body
PF: predicated region fallthrough
CT: control target
= control target key end

     0   :  { %15 = vsyncpa [#allocation4], 0  ;;  %s3335_s0 = inlined_call_operand.hbm [shape: bf16[8,64], index: 0, kind: input, shape index: {}]   ;;  %s3336_s1 = inlined_call_operand.hbm [shape: bf16[64,512], index: 1, kind: input, shape index: {}]   ;;  %s3337_s2 = inlined_call_operand.vmem [shape: f32[1,512], index: 2, kind: input, shape index: {}]   ;;  %s3338_s3 = inlined_call_operand.hbm [shape: bf16[512,512], index: 3, kind: input, shape index: {}]   ;;  %s3339_s4 = inlined_call_operand.vmem [shape: f32[1,512], index: 4, kind: input, shape index: {}]   ;;  %s3340_s5 = inlined_call_operand.hbm [shape: bf16[512,512], index: 5, kind: input, shape index: {}]   ;;  %s3341_s6 = inlined_call_operand.vmem [shape: f32[1,512], index: 6, kind: input, shape index: {}]   ;;  %s3342_s7 = inlined_call_operand.vmem [shape: bf16[1,512], index: 7, kind: input, shape index: {}]   ;;  %s3343_s8 = inlined_call_operand.<no memory space> [shape: f32[1,1], index: 8, kind: input, shape index: {}]   ;;  %s3344_s9 = inlined_call_operand.hbm [shape: f32[8,128], index: 9, kind: output, shape index: {}]  }
   0x1   :  { %16 = vsyncpa [#allocation7], 0 }
   0x2   :  { %17 = vsyncpa [#allocation10], 0 }
   0x3   :  { %18 = vsyncpa [#allocation5], 0  ;;  %s3137_s30 = smov [#allocation6]   ;;  %s3019_s13 = scalar_lea.hbm %s3336_s1, 2048 }
   0x4   :  { %s34_s10 = sshll.u32 %s3137_s30, 4  ;;  %p3020_p0 = scmp.ne.s32.totalorder %s3336_s1, %s3019_s13  ;;  %s35_s10 = int_to_ptr.vmem [resolvable:$true] %s34_s10 }
   0x5   :  { %p3023_p1 = scmp.lt.u32.totalorder %s3019_s13, %s3336_s1 }
   0x7   :  { %p3025_p2 = pnand %p3023_p1, %p3020_p0 }
   0x9   :  { %3028 = shalt.err (!%p3025_p2)
}
   0xa   :  { %s3029_s18 = scalar_lea.vmem %s35_s10, 2048  ;;  %p3034_p4 = scmp.lt.s32.totalorder %s35_s10, %s35_s10 }
   0xb   :  { %p3030_p3 = scmp.ne.s32.totalorder %s35_s10, %s3029_s18  ;;  %p3035_p5 = scmp.lt.s32.totalorder %s3029_s18, %s3029_s18 }
   0xd   :  { %p3036_p6 = por %p3035_p5, %p3034_p4 }
   0xf   :  { %p3037_p7 = pnand %p3036_p6, %p3030_p3 }
  0x11   :  { %3040 = shalt.err (!%p3037_p7)
}
  0x12   :  { %s3138_s19 = smov 256   ;;  %s3139_s20 = smov 16  }
  0x13   :  { %40 = dma.hbm_to_vmem [thread:$0]  %s3336_s1, 2048, %s35_s10, [#allocation7], %s3138_s19, %s3138_s19, %s3139_s20  }
  0x14   :  { %s3140_s23 = smov [#allocation3]   ;;  %s3141_s25 = smov [#allocation8]  }
  0x15   :  { %s25_s24 = sshll.u32 %s3140_s23, 4  ;;  %s48_s26 = sshll.u32 %s3141_s25, 4  ;;  %s26_s24 = int_to_ptr.vmem [resolvable:$true] %s25_s24  ;;  %s49_s26 = int_to_ptr.vmem [resolvable:$true] %s48_s26 }
  0x16   :  { %s3041_s29 = scalar_lea.hbm %s3335_s0, 64 }
  0x17   :  { %p3042_p8 = scmp.ne.s32.totalorder %s3335_s0, %s3041_s29  ;;  %p3045_p9 = scmp.lt.u32.totalorder %s3041_s29, %s3335_s0 }
  0x19   :  { %p3047_p10 = pnand %p3045_p9, %p3042_p8 }
  0x1b   :  { %3050 = shalt.err (!%p3047_p10)
}
  0x1c   :  { %s3051_s1 = scalar_lea.vmem %s26_s24, 64  ;;  %p3056_p12 = scmp.lt.s32.totalorder %s26_s24, %s26_s24 }
  0x1d   :  { %p3052_p11 = scmp.ne.s32.totalorder %s26_s24, %s3051_s1  ;;  %p3057_p13 = scmp.lt.s32.totalorder %s3051_s1, %s3051_s1 }
  0x1f   :  { %p3058_p0 = por %p3057_p13, %p3056_p12 }
  0x21   :  { %p3059_p1 = pnand %p3058_p0, %p3052_p11 }
  0x23   :  { %3062 = shalt.err (!%p3059_p1)
}
  0x24   :  { %28 = dma.hbm_to_vmem [thread:$0]  %s3335_s0, 64, %s26_s24, [#allocation4]  }
  0x25   :  { %s3063_s17 = scalar_lea.hbm %s3338_s3, 16384 }
  0x26   :  { %p3064_p2 = scmp.ne.s32.totalorder %s3338_s3, %s3063_s17  ;;  %p3067_p3 = scmp.lt.u32.totalorder %s3063_s17, %s3338_s3 }
  0x28   :  { %p3069_p4 = pnand %p3067_p3, %p3064_p2 }
  0x2a   :  { %3072 = shalt.err (!%p3069_p4)
}
  0x2b   :  { %s3073_s25 = scalar_lea.vmem %s49_s26, 16384  ;;  %p3078_p6 = scmp.lt.s32.totalorder %s49_s26, %s49_s26 }
  0x2c   :  { %p3074_p5 = scmp.ne.s32.totalorder %s49_s26, %s3073_s25  ;;  %p3079_p7 = scmp.lt.s32.totalorder %s3073_s25, %s3073_s25 }
  0x2e   :  { %p3080_p8 = por %p3079_p7, %p3078_p6 }
  0x30   :  { %p3081_p9 = pnand %p3080_p8, %p3074_p5 }
  0x32   :  { %3084 = shalt.err (!%p3081_p9)
}
  0x33   :  { %54 = dma.hbm_to_vmem [thread:$0]  %s3338_s3, 16384, %s49_s26, [#allocation7], %s3138_s19, %s3138_s19, %s3139_s20  }
  0x34   :  { %s3142_s27 = smov [#allocation9]   ;;  %s3085_s11 = scalar_lea.hbm %s3340_s5, 16384 }
  0x35   :  { %s62_s28 = sshll.u32 %s3142_s27, 4  ;;  %p3086_p10 = scmp.ne.s32.totalorder %s3340_s5, %s3085_s11  ;;  %s63_s28 = int_to_ptr.vmem [resolvable:$true] %s62_s28 }
  0x36   :  { %p3089_p11 = scmp.lt.u32.totalorder %s3085_s11, %s3340_s5 }
  0x38   :  { %p3091_p12 = pnand %p3089_p11, %p3086_p10 }
  0x3a   :  { %3094 = shalt.err (!%p3091_p12)
}
  0x3b   :  { %s3095_s14 = scalar_lea.vmem %s63_s28, 16384  ;;  %p3100_p0 = scmp.lt.s32.totalorder %s63_s28, %s63_s28 }
  0x3c   :  { %p3096_p13 = scmp.ne.s32.totalorder %s63_s28, %s3095_s14  ;;  %p3101_p1 = scmp.lt.s32.totalorder %s3095_s14, %s3095_s14 }
  0x3e   :  { %p3102_p2 = por %p3101_p1, %p3100_p0 }
  0x40   :  { %p3103_p3 = pnand %p3102_p2, %p3096_p13 }
  0x42   :  { %3106 = shalt.err (!%p3103_p3)
}
  0x43   :  { %68 = dma.hbm_to_vmem [thread:$0]  %s3340_s5, 16384, %s63_s28, [#allocation10], %s3138_s19, %s3138_s19, %s3139_s20  }
  0x44   :  { %3129 = dma.done.wait [#allocation4], 64  }
  0x45   :  { %3130 = vsyncadd [#allocation4], 4294967232 }
  0x46   :  { %3131 = dma.done.wait [#allocation7], 18432  }
  0x47   :  { %3132 = vsyncadd [#allocation7], 4294948864 }
  0x48   :  { %3133 = dma.done.wait [#allocation10], 16384  }
  0x49   :  { %3134 = vsyncadd [#allocation10], 4294950912  ;;  %v3143_v0 = vmov 0   ;;  %v2607_v1 = vld [vmem:[#allocation6 + $0x4] ss:$16 sps:$4 sm:$0xff]   ;;  %vm207_vm0 = vcmask 523264  }
  0x4a   :  { %243 = vmatprep.mubr.bf16.mxu0 %v3143_v0  ;;  %284 = vmatprep.mubr.bf16.mxu1 %v3143_v0  ;;  %v2609_v2 = vld [vmem:[#allocation6] ss:$16 sps:$4 sm:$0xff]   ;;  %v2610_v3 = vld [vmem:[#allocation6 + $0x24] ss:$16 sps:$4 sm:$0xff]   ;;  %v2619_v7 = vld [vmem:[#allocation6 + $0xc] ss:$16 sps:$4 sm:$0xff]  }
  0x4b   :  { %211 = vmatprep.subr.bf16.mxu0 %v2607_v1  ;;  %v2612_v4 = vld [vmem:[#allocation6 + $0x20] ss:$16 sps:$4 sm:$0xff]   ;;  %v2613_v5 = vld [vmem:[#allocation6 + $0x44] ss:$16 sps:$4 sm:$0xff]   ;;  %v2621_v8 = vld [vmem:[#allocation6 + $0x8] ss:$16 sps:$4 sm:$0xff]   ;;  %252 = vmatprep.subr.bf16.mxu1 %v2619_v7 }
  0x4c   :  { %212 = vmatpush1.bf16.msra.mxu0 %v2609_v2  ;;  %v2615_v6 = vld [vmem:[#allocation6 + $0x40] ss:$16 sps:$4 sm:$0xff]   ;;  %v2622_v9 = vld [vmem:[#allocation6 + $0x2c] ss:$16 sps:$4 sm:$0xff]   ;;  %v2616_v10 = vld [vmem:[#allocation6 + $0x64] ss:$16 sps:$4 sm:$0xff]   ;;  %253 = vmatpush1.bf16.msra.mxu1 %v2621_v8 }
  0x4d   :  { %213 = vmatprep.subr.bf16.mxu0 %v2610_v3  ;;  %v2624_v11 = vld [vmem:[#allocation6 + $0x28] ss:$16 sps:$4 sm:$0xff]   ;;  %254 = vmatprep.subr.bf16.mxu1 %v2622_v9  ;;  %v2625_v12 = vld [vmem:[#allocation6 + $0x4c] ss:$16 sps:$4 sm:$0xff]   ;;  %v2618_v13 = vld [vmem:[#allocation6 + $0x60] ss:$16 sps:$4 sm:$0xff]  }
  0x4e   :  { %v2633_v14 = vld [vmem:[#allocation8 + $0x4] ss:$16 sps:$4 sm:$0xff]   ;;  %v2627_v15 = vld [vmem:[#allocation6 + $0x48] ss:$16 sps:$4 sm:$0xff]   ;;  %v88_v16 = vld [vmem:[#allocation3] sm:$0xf] }
  0x4f   :  { %v2628_v17 = vld [vmem:[#allocation6 + $0x6c] ss:$16 sps:$4 sm:$0xff]   ;;  %v2631_v18 = vld [vmem:[#allocation8] ss:$16 sps:$4 sm:$0xff]   ;;  %v2639_v19 = vld [vmem:[#allocation8 + $0x24] ss:$16 sps:$4 sm:$0xff]  }
  0x50   :  { %214 = vmatpush1.bf16.msra.mxu0 %v2612_v4  ;;  %255 = vmatpush1.bf16.msra.mxu1 %v2624_v11  ;;  %v2630_v20 = vld [vmem:[#allocation6 + $0x68] ss:$16 sps:$4 sm:$0xff]   ;;  %v2636_v21 = vld [vmem:[#allocation8 + $0xc] ss:$16 sps:$4 sm:$0xff]   ;;  %v2637_v22 = vld [vmem:[#allocation8 + $0x20] ss:$16 sps:$4 sm:$0xff]  }
  0x51   :  { %215 = vmatprep.subr.bf16.mxu0 %v2613_v5  ;;  %256 = vmatprep.subr.bf16.mxu1 %v2625_v12  ;;  %v2645_v23 = vld [vmem:[#allocation8 + $0x44] ss:$16 sps:$4 sm:$0xff]   ;;  %v2634_v24 = vld [vmem:[#allocation8 + $0x8] ss:$16 sps:$4 sm:$0xff]   ;;  %v2642_v25 = vld [vmem:[#allocation8 + $0x2c] ss:$16 sps:$4 sm:$0xff]  }
  0x52   :  { %v2643_v26 = vld [vmem:[#allocation8 + $0x40] ss:$16 sps:$4 sm:$0xff]   ;;  %v2651_v27 = vld [vmem:[#allocation8 + $0x64] ss:$16 sps:$4 sm:$0xff]   ;;  %v2640_v28 = vld [vmem:[#allocation8 + $0x28] ss:$16 sps:$4 sm:$0xff]  }
  0x53   :  { %v2648_v29 = vld [vmem:[#allocation8 + $0x4c] ss:$16 sps:$4 sm:$0xff]   ;;  %v2649_v30 = vld [vmem:[#allocation8 + $0x60] ss:$16 sps:$4 sm:$0xff]   ;;  %v2657_v31 = vld [vmem:[#allocation8 + $0x84] ss:$16 sps:$4 sm:$0xff]  }
  0x54   :  { %216 = vmatpush1.bf16.msra.mxu0 %v2615_v6  ;;  %257 = vmatpush1.bf16.msra.mxu1 %v2627_v15  ;;  %v2646_v32 = vld [vmem:[#allocation8 + $0x48] ss:$16 sps:$4 sm:$0xff]   ;;  %v2654_v33 = vld [vmem:[#allocation8 + $0x6c] ss:$16 sps:$4 sm:$0xff]   ;;  %v2655_v34 = vld [vmem:[#allocation8 + $0x80] ss:$16 sps:$4 sm:$0xff]  }
  0x55   :  { %217 = vmatprep.subr.bf16.mxu0 %v2616_v10  ;;  %258 = vmatprep.subr.bf16.mxu1 %v2628_v17  ;;  %v2663_v35 = vld [vmem:[#allocation8 + $0xa4] ss:$16 sps:$4 sm:$0xff]   ;;  %v2652_v36 = vld [vmem:[#allocation8 + $0x68] ss:$16 sps:$4 sm:$0xff]   ;;  %v2660_v37 = vld [vmem:[#allocation8 + $0x8c] ss:$16 sps:$4 sm:$0xff]  }
  0x56   :  { %v2661_v38 = vld [vmem:[#allocation8 + $0xa0] ss:$16 sps:$4 sm:$0xff]   ;;  %v2669_v39 = vld [vmem:[#allocation8 + $0xc4] ss:$16 sps:$4 sm:$0xff]   ;;  %v2658_v40 = vld [vmem:[#allocation8 + $0x88] ss:$16 sps:$4 sm:$0xff]  }
  0x57   :  { %v2666_v41 = vld [vmem:[#allocation8 + $0xac] ss:$16 sps:$4 sm:$0xff]   ;;  %v2667_v42 = vld [vmem:[#allocation8 + $0xc0] ss:$16 sps:$4 sm:$0xff]   ;;  %v2675_v43 = vld [vmem:[#allocation8 + $0xe4] ss:$16 sps:$4 sm:$0xff]  }
  0x58   :  { %218 = vmatpush1.bf16.msra.mxu0 %v2618_v13  ;;  %259 = vmatpush1.bf16.msra.mxu1 %v2630_v20  ;;  %v2664_v44 = vld [vmem:[#allocation8 + $0xa8] ss:$16 sps:$4 sm:$0xff]   ;;  %v2672_v45 = vld [vmem:[#allocation8 + $0xcc] ss:$16 sps:$4 sm:$0xff]   ;;  %v2673_v46 = vld [vmem:[#allocation8 + $0xe0] ss:$16 sps:$4 sm:$0xff]   ;;  %v107_v20 = vlaneseq }
  0x59   :  { %1091 = vmatprep.subr.bf16.mxu0 %v2633_v14  ;;  %1173 = vmatprep.subr.bf16.mxu1 %v2636_v21  ;;  %v2681_v47 = vld [vmem:[#allocation8 + $0x104] ss:$16 sps:$4 sm:$0xff]   ;;  %v2670_v48 = vld [vmem:[#allocation8 + $0xc8] ss:$16 sps:$4 sm:$0xff]   ;;  %v2678_v49 = vld [vmem:[#allocation8 + $0xec] ss:$16 sps:$4 sm:$0xff]  }
  0x5a   :  { %v2676_v50 = vld [vmem:[#allocation8 + $0xe8] ss:$16 sps:$4 sm:$0xff]   ;;  %v2679_v51 = vld [vmem:[#allocation8 + $0x100] ss:$16 sps:$4 sm:$0xff]   ;;  %v2684_v52 = vld [vmem:[#allocation8 + $0x10c] ss:$16 sps:$4 sm:$0xff]  }
  0x5b   :  { %2316 = vmatmul.mubr.msk.bf16.vlgmr.msra.gmra.mrb[0].mxu0 %vm207_vm0, %v88_v16  ;;  %2317 = vmatmul.mubr.msk.bf16.vlgmr.msra.gmra.mrb[0].mxu1 %vm207_vm0, %v88_v16  ;;  %v2687_v53 = vld [vmem:[#allocation8 + $0x124] ss:$16 sps:$4 sm:$0xff]   ;;  %v2685_v54 = vld [vmem:[#allocation8 + $0x120] ss:$16 sps:$4 sm:$0xff]   ;;  %v2682_v56 = vld [vmem:[#allocation8 + $0x108] ss:$16 sps:$4 sm:$0xff]  }
  0x5c   :  { %1092 = vmatpush1.bf16.msra.mxu0 %v2631_v18  ;;  %1174 = vmatpush1.bf16.msra.mxu1 %v2634_v24  ;;  %v2693_v55 = vld [vmem:[#allocation8 + $0x144] ss:$16 sps:$4 sm:$0xff]   ;;  %v2690_v57 = vld [vmem:[#allocation8 + $0x12c] ss:$16 sps:$4 sm:$0xff]   ;;  %v2691_v58 = vld [vmem:[#allocation8 + $0x140] ss:$16 sps:$4 sm:$0xff]  }
  0x5d   :  { %1093 = vmatprep.subr.bf16.mxu0 %v2639_v19  ;;  %1175 = vmatprep.subr.bf16.mxu1 %v2642_v25  ;;  %v2699_v59 = vld [vmem:[#allocation8 + $0x164] ss:$16 sps:$4 sm:$0xff]   ;;  %v2688_v60 = vld [vmem:[#allocation8 + $0x128] ss:$16 sps:$4 sm:$0xff]   ;;  %v2696_v61 = vld [vmem:[#allocation8 + $0x14c] ss:$16 sps:$4 sm:$0xff]  }
  0x5e   :  { %v2697_v62 = vld [vmem:[#allocation8 + $0x160] ss:$16 sps:$4 sm:$0xff]   ;;  %v2705_v63 = vld [vmem:[#allocation8 + $0x184] ss:$16 sps:$4 sm:$0xff]   ;;  %v2694_v0 = vld [vmem:[#allocation8 + $0x148] ss:$16 sps:$4 sm:$0xff]  }
  0x5f   :  { %v2702_v1 = vld [vmem:[#allocation8 + $0x16c] ss:$16 sps:$4 sm:$0xff]   ;;  %v2703_v2 = vld [vmem:[#allocation8 + $0x180] ss:$16 sps:$4 sm:$0xff]   ;;  %v2711_v3 = vld [vmem:[#allocation8 + $0x1a4] ss:$16 sps:$4 sm:$0xff]  }
  0x60   :  { %1094 = vmatpush1.bf16.msra.mxu0 %v2637_v22  ;;  %1176 = vmatpush1.bf16.msra.mxu1 %v2640_v28  ;;  %v2700_v4 = vld [vmem:[#allocation8 + $0x168] ss:$16 sps:$4 sm:$0xff]   ;;  %v2708_v5 = vld [vmem:[#allocation8 + $0x18c] ss:$16 sps:$4 sm:$0xff]   ;;  %v2709_v6 = vld [vmem:[#allocation8 + $0x1a0] ss:$16 sps:$4 sm:$0xff]  }
  0x61   :  { %1095 = vmatprep.subr.bf16.mxu0 %v2645_v23  ;;  %1177 = vmatprep.subr.bf16.mxu1 %v2648_v29  ;;  %v2706_v7 = vld [vmem:[#allocation8 + $0x188] ss:$16 sps:$4 sm:$0xff]   ;;  %v2714_v8 = vld [vmem:[#allocation8 + $0x1ac] ss:$16 sps:$4 sm:$0xff]   ;;  %v2717_v10 = vld [vmem:[#allocation8 + $0x1c4] ss:$16 sps:$4 sm:$0xff]  }
  0x62   :  { %v2712_v9 = vld [vmem:[#allocation8 + $0x1a8] ss:$16 sps:$4 sm:$0xff]   ;;  %v2720_v11 = vld [vmem:[#allocation8 + $0x1cc] ss:$16 sps:$4 sm:$0xff]   ;;  %v2715_v12 = vld [vmem:[#allocation8 + $0x1c0] ss:$16 sps:$4 sm:$0xff]  }
  0x63   :  { %v2718_v13 = vld [vmem:[#allocation8 + $0x1c8] ss:$16 sps:$4 sm:$0xff]   ;;  %v2723_v14 = vld [vmem:[#allocation8 + $0x1e4] ss:$16 sps:$4 sm:$0xff]   ;;  %v2726_v15 = vld [vmem:[#allocation8 + $0x1ec] ss:$16 sps:$4 sm:$0xff]  }
  0x64   :  { %1096 = vmatpush1.bf16.msra.mxu0 %v2643_v26  ;;  %1178 = vmatpush1.bf16.msra.mxu1 %v2646_v32  ;;  %v2721_v16 = vld [vmem:[#allocation8 + $0x1e0] ss:$16 sps:$4 sm:$0xff]   ;;  %v2724_v17 = vld [vmem:[#allocation8 + $0x1e8] ss:$16 sps:$4 sm:$0xff]   ;;  %v2729_v18 = vld [vmem:[#allocation8 + $0x204] ss:$16 sps:$4 sm:$0xff]  }
  0x65   :  { %1097 = vmatprep.subr.bf16.mxu0 %v2651_v27  ;;  %1179 = vmatprep.subr.bf16.mxu1 %v2654_v33  ;;  %v2732_v19 = vld [vmem:[#allocation8 + $0x20c] ss:$16 sps:$4 sm:$0xff]   ;;  %v3255_v21 = vshrl.u32 %v107_v20, 7  ;;  %s3144_s18 = smov [#allocation11]  }
  0x66   :  { %v3263_v23 = vld [vmem:[%s3337_s2] sm:$0xf]  ;;  %s2289_s21 = sshll.u32 %s3144_s18, 4  ;;  %s2290_s21 = int_to_ptr.vmem [resolvable:$true] %s2289_s21 }
  0x67   :  { %v3258_v22 = vsub.s32 0, %v3255_v21  ;;  %v3266_v24 = vsub.s32 1, %v3255_v21  ;;  %v3273_v28 = vsub.s32 3, %v3255_v21  ;;  %s3107_s22 = scalar_lea.vmem %s2290_s21, 128  ;;  %p3112_p5 = scmp.lt.s32.totalorder %s2290_s21, %s2290_s21 }
  0x68   :  { %1098 = vmatpush1.bf16.msra.mxu0 %v2649_v30  ;;  %1180 = vmatpush1.bf16.msra.mxu1 %v2652_v36  ;;  %p3108_p4 = scmp.ne.s32.totalorder %s2290_s21, %s3107_s22  ;;  %p3113_p6 = scmp.lt.s32.totalorder %s3107_s22, %s3107_s22 }
  0x69   :  { %1099 = vmatprep.subr.bf16.mxu0 %v2657_v31  ;;  %1181 = vmatprep.subr.bf16.mxu1 %v2660_v37  ;;  %v110_v25 = vrot.slane %v3263_v23, %v3258_v22  ;;  %v114_v26 = vrot.slane %v3263_v23, %v3266_v24  ;;  %v122_v36 = vrot.slane %v3263_v23, %v3273_v28 }
  0x6a   :  { %p3114_p7 = por %p3113_p6, %p3112_p5 }
  0x6c   :  { %1100 = vmatpush1.bf16.msra.mxu0 %v2655_v34  ;;  %1182 = vmatpush1.bf16.msra.mxu1 %v2658_v40  ;;  %p3115_p8 = pnand %p3114_p7, %p3108_p4 }
  0x6d   :  { %1101 = vmatprep.subr.bf16.mxu0 %v2663_v35  ;;  %1183 = vmatprep.subr.bf16.mxu1 %v2666_v41 }
  0x70   :  { %1102 = vmatpush1.bf16.msra.mxu0 %v2661_v38  ;;  %1184 = vmatpush1.bf16.msra.mxu1 %v2664_v44  ;;  %v2727_v38 = vld [vmem:[#allocation8 + $0x200] ss:$16 sps:$4 sm:$0xff]  }
  0x71   :  { %1103 = vmatprep.subr.bf16.mxu0 %v2669_v39  ;;  %1185 = vmatprep.subr.bf16.mxu1 %v2672_v45  ;;  %v2730_v39 = vld [vmem:[#allocation8 + $0x208] ss:$16 sps:$4 sm:$0xff]  }
  0x74   :  { %1104 = vmatpush1.bf16.msra.mxu0 %v2667_v42  ;;  %1186 = vmatpush1.bf16.msra.mxu1 %v2670_v48  ;;  %v2735_v42 = vld [vmem:[#allocation8 + $0x224] ss:$16 sps:$4 sm:$0xff]   ;;  %v2733_v48 = vld [vmem:[#allocation8 + $0x220] ss:$16 sps:$4 sm:$0xff]  }
  0x75   :  { %1105 = vmatprep.subr.bf16.mxu0 %v2675_v43  ;;  %1187 = vmatprep.subr.bf16.mxu1 %v2678_v49  ;;  %v2738_v43 = vld [vmem:[#allocation8 + $0x22c] ss:$16 sps:$4 sm:$0xff]   ;;  %v2736_v49 = vld [vmem:[#allocation8 + $0x228] ss:$16 sps:$4 sm:$0xff]  }
  0x78   :  { %1106 = vmatpush1.bf16.msra.mxu0 %v2673_v46  ;;  %1188 = vmatpush1.bf16.msra.mxu1 %v2676_v50 }
  0x79   :  { %1107 = vmatprep.subr.bf16.mxu0 %v2681_v47  ;;  %1189 = vmatprep.subr.bf16.mxu1 %v2684_v52  ;;  %v2744_v52 = vld [vmem:[#allocation8 + $0x24c] ss:$16 sps:$4 sm:$0xff]  }
  0x7c   :  { %1108 = vmatpush1.bf16.msra.mxu0 %v2679_v51  ;;  %1190 = vmatpush1.bf16.msra.mxu1 %v2682_v56  ;;  %v2741_v51 = vld [vmem:[#allocation8 + $0x244] ss:$16 sps:$4 sm:$0xff]  }
  0x7d   :  { %1109 = vmatprep.subr.bf16.mxu0 %v2687_v53  ;;  %1191 = vmatprep.subr.bf16.mxu1 %v2690_v57  ;;  %v2747_v56 = vld [vmem:[#allocation8 + $0x264] ss:$16 sps:$4 sm:$0xff]   ;;  %v2750_v57 = vld [vmem:[#allocation8 + $0x26c] ss:$16 sps:$4 sm:$0xff]  }
  0x80   :  { %1110 = vmatpush1.bf16.msra.mxu0 %v2685_v54  ;;  %1192 = vmatpush1.bf16.msra.mxu1 %v2688_v60  ;;  %v2739_v54 = vld [vmem:[#allocation8 + $0x240] ss:$16 sps:$4 sm:$0xff]   ;;  %v2753_v60 = vld [vmem:[#allocation8 + $0x284] ss:$16 sps:$4 sm:$0xff]  }
  0x81   :  { %1111 = vmatprep.subr.bf16.mxu0 %v2693_v55  ;;  %1193 = vmatprep.subr.bf16.mxu1 %v2696_v61  ;;  %v2742_v55 = vld [vmem:[#allocation8 + $0x248] ss:$16 sps:$4 sm:$0xff]   ;;  %v2756_v61 = vld [vmem:[#allocation8 + $0x28c] ss:$16 sps:$4 sm:$0xff]  }
  0x84   :  { %1112 = vmatpush1.bf16.msra.mxu0 %v2691_v58  ;;  %1194 = vmatpush1.bf16.msra.mxu1 %v2694_v0  ;;  %v2745_v58 = vld [vmem:[#allocation8 + $0x260] ss:$16 sps:$4 sm:$0xff]   ;;  %v2759_v0 = vld [vmem:[#allocation8 + $0x2a4] ss:$16 sps:$4 sm:$0xff]  }
  0x85   :  { %1113 = vmatprep.subr.bf16.mxu0 %v2699_v59  ;;  %1195 = vmatprep.subr.bf16.mxu1 %v2702_v1  ;;  %v2748_v59 = vld [vmem:[#allocation8 + $0x268] ss:$16 sps:$4 sm:$0xff]   ;;  %v2762_v1 = vld [vmem:[#allocation8 + $0x2ac] ss:$16 sps:$4 sm:$0xff]  }
  0x88   :  { %1114 = vmatpush1.bf16.msra.mxu0 %v2697_v62  ;;  %1196 = vmatpush1.bf16.msra.mxu1 %v2700_v4  ;;  %v2751_v62 = vld [vmem:[#allocation8 + $0x280] ss:$16 sps:$4 sm:$0xff]   ;;  %v2765_v4 = vld [vmem:[#allocation8 + $0x2c4] ss:$16 sps:$4 sm:$0xff]  }
  0x89   :  { %1115 = vmatprep.subr.bf16.mxu0 %v2705_v63  ;;  %1197 = vmatprep.subr.bf16.mxu1 %v2708_v5  ;;  %v2754_v63 = vld [vmem:[#allocation8 + $0x288] ss:$16 sps:$4 sm:$0xff]   ;;  %v2768_v5 = vld [vmem:[#allocation8 + $0x2cc] ss:$16 sps:$4 sm:$0xff]  }
  0x8c   :  { %1116 = vmatpush1.bf16.msra.mxu0 %v2703_v2  ;;  %1198 = vmatpush1.bf16.msra.mxu1 %v2706_v7  ;;  %v2757_v2 = vld [vmem:[#allocation8 + $0x2a0] ss:$16 sps:$4 sm:$0xff]   ;;  %v2766_v7 = vld [vmem:[#allocation8 + $0x2c8] ss:$16 sps:$4 sm:$0xff]  }
  0x8d   :  { %1117 = vmatprep.subr.bf16.mxu0 %v2711_v3  ;;  %1199 = vmatprep.subr.bf16.mxu1 %v2714_v8  ;;  %v2760_v3 = vld [vmem:[#allocation8 + $0x2a8] ss:$16 sps:$4 sm:$0xff]   ;;  %v2771_v8 = vld [vmem:[#allocation8 + $0x2e4] ss:$16 sps:$4 sm:$0xff]  }
  0x90   :  { %1118 = vmatpush1.bf16.msra.mxu0 %v2709_v6  ;;  %1200 = vmatpush1.bf16.msra.mxu1 %v2712_v9  ;;  %v2763_v6 = vld [vmem:[#allocation8 + $0x2c0] ss:$16 sps:$4 sm:$0xff]   ;;  %v2774_v9 = vld [vmem:[#allocation8 + $0x2ec] ss:$16 sps:$4 sm:$0xff]  }
  0x91   :  { %1119 = vmatprep.subr.bf16.mxu0 %v2717_v10  ;;  %1201 = vmatprep.subr.bf16.mxu1 %v2720_v11  ;;  %v2769_v10 = vld [vmem:[#allocation8 + $0x2e0] ss:$16 sps:$4 sm:$0xff]   ;;  %v2772_v11 = vld [vmem:[#allocation8 + $0x2e8] ss:$16 sps:$4 sm:$0xff]  }
  0x94   :  { %1120 = vmatpush1.bf16.msra.mxu0 %v2715_v12  ;;  %1202 = vmatpush1.bf16.msra.mxu1 %v2718_v13  ;;  %v2777_v12 = vld [vmem:[#allocation8 + $0x304] ss:$16 sps:$4 sm:$0xff]   ;;  %v2780_v13 = vld [vmem:[#allocation8 + $0x30c] ss:$16 sps:$4 sm:$0xff]  }
  0x95   :  { %1121 = vmatprep.subr.bf16.mxu0 %v2723_v14  ;;  %1203 = vmatprep.subr.bf16.mxu1 %v2726_v15  ;;  %v2775_v14 = vld [vmem:[#allocation8 + $0x300] ss:$16 sps:$4 sm:$0xff]   ;;  %v2778_v15 = vld [vmem:[#allocation8 + $0x308] ss:$16 sps:$4 sm:$0xff]  }
  0x98   :  { %1122 = vmatpush1.bf16.msra.mxu0 %v2721_v16  ;;  %1204 = vmatpush1.bf16.msra.mxu1 %v2724_v17  ;;  %v2783_v16 = vld [vmem:[#allocation8 + $0x324] ss:$16 sps:$4 sm:$0xff]   ;;  %v2786_v17 = vld [vmem:[#allocation8 + $0x32c] ss:$16 sps:$4 sm:$0xff]  }
  0x99   :  { %1132 = vmatprep.subr.bf16.mxu0 %v2729_v18  ;;  %1214 = vmatprep.subr.bf16.mxu1 %v2732_v19  ;;  %v2781_v18 = vld [vmem:[#allocation8 + $0x320] ss:$16 sps:$4 sm:$0xff]   ;;  %v2784_v19 = vld [vmem:[#allocation8 + $0x328] ss:$16 sps:$4 sm:$0xff]  }
 0x12e   :  { %v245_v27 = vpop.f32.mrb[0].mxu0  ;;  %v3277_v40 = vpop.f32.mrb[0].mxu1 }
 0x12f   :  { %v246_v29 = vadd.f32 %v245_v27, %v110_v25  ;;  %v247_v30 = vpop.f32.mrb[1].mxu0  ;;  %v288_v44 = vpop.f32.mrb[1].mxu1  ;;  %v2789_v25 = vld [vmem:[#allocation8 + $0x344] ss:$16 sps:$4 sm:$0xff]   ;;  %v2787_v27 = vld [vmem:[#allocation8 + $0x340] ss:$16 sps:$4 sm:$0xff]  }
 0x130   :  { %v248_v31 = vadd.f32 %v247_v30, %v114_v26  ;;  %v249_v32 = vpop.f32.mrb[2].mxu0  ;;  %v289_v45 = vadd.f32 %v288_v44, %v122_v36  ;;  %v290_v46 = vpop.f32.mrb[2].mxu1  ;;  %v2792_v26 = vld [vmem:[#allocation8 + $0x34c] ss:$16 sps:$4 sm:$0xff]   ;;  %v2795_v30 = vld [vmem:[#allocation8 + $0x364] ss:$16 sps:$4 sm:$0xff]  }
 0x131   :  { %v293_v33 = vmax.f32 %v246_v29, 0.0  ;;  %v250_v34 = vpop.f32.mrb[3].mxu0  ;;  %v291_v47 = vpop.f32.mrb[3].mxu1  ;;  %v2790_v29 = vld [vmem:[#allocation8 + $0x348] ss:$16 sps:$4 sm:$0xff]  }
 0x132   :  { %v294_v35 = vmax.f32 %v248_v31, 0.0  ;;  %v296_v50 = vmax.f32 %v289_v45, 0.0  ;;  %v2798_v31 = vld [vmem:[#allocation8 + $0x36c] ss:$16 sps:$4 sm:$0xff]   ;;  %v2793_v32 = vld [vmem:[#allocation8 + $0x360] ss:$16 sps:$4 sm:$0xff]  }
 0x133   :  { %v297_v41 = vpack.c.bf16 %v293_v33, %v293_v33  ;;  %v2796_v33 = vld [vmem:[#allocation8 + $0x368] ss:$16 sps:$4 sm:$0xff]   ;;  %v2801_v34 = vld [vmem:[#allocation8 + $0x384] ss:$16 sps:$4 sm:$0xff]   ;;  %v2799_v36 = vld [vmem:[#allocation8 + $0x380] ss:$16 sps:$4 sm:$0xff]  }
 0x134   :  { %v298_v37 = vpack.c.bf16 %v294_v35, %v294_v35  ;;  %v300_v53 = vpack.c.bf16 %v296_v50, %v296_v50  ;;  %v2804_v35 = vld [vmem:[#allocation8 + $0x38c] ss:$16 sps:$4 sm:$0xff]   ;;  %v2813_v45 = vld [vmem:[#allocation8 + $0x3c4] ss:$16 sps:$4 sm:$0xff]   ;;  %v2811_v47 = vld [vmem:[#allocation8 + $0x3c0] ss:$16 sps:$4 sm:$0xff]  }
 0x135   :  { %v2816_v46 = vld [vmem:[#allocation8 + $0x3cc] ss:$16 sps:$4 sm:$0xff]   ;;  %v2819_v50 = vld [vmem:[#allocation8 + $0x3e4] ss:$16 sps:$4 sm:$0xff]  }
 0x136   :  { %1123 = vmatprep.mubr.bf16.mxu0 %v298_v37  ;;  %1205 = vmatprep.mubr.bf16.mxu1 %v298_v37  ;;  %v2802_v37 = vld [vmem:[#allocation8 + $0x388] ss:$16 sps:$4 sm:$0xff]  }
 0x137   :  { %1124 = vmatmul.mubr.bf16.vlgmr.msra.gmra.mrb[4].mxu0 %v297_v41  ;;  %1206 = vmatmul.mubr.bf16.vlgmr.msra.gmra.mrb[4].mxu1 %v297_v41  ;;  %v2810_v41 = vld [vmem:[#allocation8 + $0x3ac] ss:$16 sps:$4 sm:$0xff]  }
 0x138   :  { %1133 = vmatpush1.bf16.msra.mxu0 %v2727_v38  ;;  %1215 = vmatpush1.bf16.msra.mxu1 %v2730_v39  ;;  %v3280_v38 = vsub.s32 2, %v3255_v21  ;;  %v2807_v39 = vld [vmem:[#allocation8 + $0x3a4] ss:$16 sps:$4 sm:$0xff]  }
 0x139   :  { %1134 = vmatprep.subr.bf16.mxu0 %v2735_v42  ;;  %1216 = vmatprep.subr.bf16.mxu1 %v2738_v43  ;;  %v2805_v42 = vld [vmem:[#allocation8 + $0x3a0] ss:$16 sps:$4 sm:$0xff]   ;;  %v2808_v43 = vld [vmem:[#allocation8 + $0x3a8] ss:$16 sps:$4 sm:$0xff]  }
 0x13a   :  { %1164 = vmatprep.mubr.bf16.mxu0 %v300_v53  ;;  %1246 = vmatprep.mubr.bf16.mxu1 %v300_v53  ;;  %v118_v44 = vrot.slane %v3263_v23, %v3280_v38  ;;  %v2820_v53 = vld [vmem:[#allocation8 + $0x3e8] ss:$16 sps:$4 sm:$0xff]   ;;  %v2825_v23 = vld [vmem:[#allocation9 + $0x4] ss:$16 sps:$4 sm:$0xff]  }
 0x13c   :  { %1135 = vmatpush1.bf16.msra.mxu0 %v2733_v48  ;;  %1217 = vmatpush1.bf16.msra.mxu1 %v2736_v49  ;;  %v2814_v48 = vld [vmem:[#allocation8 + $0x3c8] ss:$16 sps:$4 sm:$0xff]   ;;  %v287_v49 = vadd.f32 %v3277_v40, %v118_v44  ;;  %v2831_v40 = vld [vmem:[#allocation9 + $0x24] ss:$16 sps:$4 sm:$0xff]   ;;  %v2889_v44 = vld [vmem:[#allocation9 + $0x160] ss:$16 sps:$4 sm:$0xff]  }
 0x13d   :  { %1136 = vmatprep.subr.bf16.mxu0 %v2741_v51  ;;  %1218 = vmatprep.subr.bf16.mxu1 %v2744_v52  ;;  %v2822_v51 = vld [vmem:[#allocation8 + $0x3ec] ss:$16 sps:$4 sm:$0xff]   ;;  %v2817_v52 = vld [vmem:[#allocation8 + $0x3e0] ss:$16 sps:$4 sm:$0xff]  }
 0x140   :  { %1137 = vmatpush1.bf16.msra.mxu0 %v2739_v54  ;;  %1219 = vmatpush1.bf16.msra.mxu1 %v2742_v55  ;;  %v295_v54 = vmax.f32 %v287_v49, 0.0  ;;  %v2828_v55 = vld [vmem:[#allocation9 + $0xc] ss:$16 sps:$4 sm:$0xff]   ;;  %v2898_v49 = vld [vmem:[#allocation9 + $0x188] ss:$16 sps:$4 sm:$0xff]  }
 0x141   :  { %1138 = vmatprep.subr.bf16.mxu0 %v2747_v56  ;;  %1220 = vmatprep.subr.bf16.mxu1 %v2750_v57  ;;  %v2823_v56 = vld [vmem:[#allocation9] ss:$16 sps:$4 sm:$0xff]   ;;  %v2826_v57 = vld [vmem:[#allocation9 + $0x8] ss:$16 sps:$4 sm:$0xff]  }
 0x144   :  { %1139 = vmatpush1.bf16.msra.mxu0 %v2745_v58  ;;  %1221 = vmatpush1.bf16.msra.mxu1 %v2748_v59  ;;  %v299_v58 = vpack.c.bf16 %v295_v54, %v295_v54  ;;  %v2834_v59 = vld [vmem:[#allocation9 + $0x2c] ss:$16 sps:$4 sm:$0xff]   ;;  %v2909_v54 = vld [vmem:[#allocation9 + $0x1c4] ss:$16 sps:$4 sm:$0xff]  }
 0x145   :  { %1140 = vmatprep.subr.bf16.mxu0 %v2753_v60  ;;  %1222 = vmatprep.subr.bf16.mxu1 %v2756_v61  ;;  %v2829_v60 = vld [vmem:[#allocation9 + $0x20] ss:$16 sps:$4 sm:$0xff]   ;;  %v2832_v61 = vld [vmem:[#allocation9 + $0x28] ss:$16 sps:$4 sm:$0xff]  }
 0x148   :  { %1141 = vmatpush1.bf16.msra.mxu0 %v2751_v62  ;;  %1223 = vmatpush1.bf16.msra.mxu1 %v2754_v63  ;;  %v2837_v62 = vld [vmem:[#allocation9 + $0x44] ss:$16 sps:$4 sm:$0xff]   ;;  %v2840_v63 = vld [vmem:[#allocation9 + $0x4c] ss:$16 sps:$4 sm:$0xff]  }
 0x149   :  { %1142 = vmatprep.subr.bf16.mxu0 %v2759_v0  ;;  %1224 = vmatprep.subr.bf16.mxu1 %v2762_v1  ;;  %v2835_v0 = vld [vmem:[#allocation9 + $0x40] ss:$16 sps:$4 sm:$0xff]   ;;  %v2838_v1 = vld [vmem:[#allocation9 + $0x48] ss:$16 sps:$4 sm:$0xff]  }
 0x14c   :  { %1143 = vmatpush1.bf16.msra.mxu0 %v2757_v2  ;;  %1225 = vmatpush1.bf16.msra.mxu1 %v2760_v3  ;;  %v2843_v2 = vld [vmem:[#allocation9 + $0x64] ss:$16 sps:$4 sm:$0xff]   ;;  %v2846_v3 = vld [vmem:[#allocation9 + $0x6c] ss:$16 sps:$4 sm:$0xff]  }
 0x14d   :  { %1144 = vmatprep.subr.bf16.mxu0 %v2765_v4  ;;  %1226 = vmatprep.subr.bf16.mxu1 %v2768_v5  ;;  %v2841_v4 = vld [vmem:[#allocation9 + $0x60] ss:$16 sps:$4 sm:$0xff]   ;;  %v2844_v5 = vld [vmem:[#allocation9 + $0x68] ss:$16 sps:$4 sm:$0xff]  }
 0x150   :  { %1145 = vmatpush1.bf16.msra.mxu0 %v2763_v6  ;;  %1227 = vmatpush1.bf16.msra.mxu1 %v2766_v7  ;;  %v2849_v6 = vld [vmem:[#allocation9 + $0x84] ss:$16 sps:$4 sm:$0xff]   ;;  %v2852_v7 = vld [vmem:[#allocation9 + $0x8c] ss:$16 sps:$4 sm:$0xff]  }
 0x151   :  { %1146 = vmatprep.subr.bf16.mxu0 %v2771_v8  ;;  %1228 = vmatprep.subr.bf16.mxu1 %v2774_v9  ;;  %v2847_v8 = vld [vmem:[#allocation9 + $0x80] ss:$16 sps:$4 sm:$0xff]   ;;  %v2850_v9 = vld [vmem:[#allocation9 + $0x88] ss:$16 sps:$4 sm:$0xff]  }
 0x154   :  { %1147 = vmatpush1.bf16.msra.mxu0 %v2769_v10  ;;  %1229 = vmatpush1.bf16.msra.mxu1 %v2772_v11  ;;  %v2855_v10 = vld [vmem:[#allocation9 + $0xa4] ss:$16 sps:$4 sm:$0xff]   ;;  %v2858_v11 = vld [vmem:[#allocation9 + $0xac] ss:$16 sps:$4 sm:$0xff]  }
 0x155   :  { %1148 = vmatprep.subr.bf16.mxu0 %v2777_v12  ;;  %1230 = vmatprep.subr.bf16.mxu1 %v2780_v13  ;;  %v2853_v12 = vld [vmem:[#allocation9 + $0xa0] ss:$16 sps:$4 sm:$0xff]   ;;  %v2856_v13 = vld [vmem:[#allocation9 + $0xa8] ss:$16 sps:$4 sm:$0xff]  }
 0x158   :  { %1149 = vmatpush1.bf16.msra.mxu0 %v2775_v14  ;;  %1231 = vmatpush1.bf16.msra.mxu1 %v2778_v15  ;;  %v2861_v14 = vld [vmem:[#allocation9 + $0xc4] ss:$16 sps:$4 sm:$0xff]   ;;  %v2864_v15 = vld [vmem:[#allocation9 + $0xcc] ss:$16 sps:$4 sm:$0xff]  }
 0x159   :  { %1150 = vmatprep.subr.bf16.mxu0 %v2783_v16  ;;  %1232 = vmatprep.subr.bf16.mxu1 %v2786_v17  ;;  %v2859_v16 = vld [vmem:[#allocation9 + $0xc0] ss:$16 sps:$4 sm:$0xff]   ;;  %v2862_v17 = vld [vmem:[#allocation9 + $0xc8] ss:$16 sps:$4 sm:$0xff]  }
 0x15c   :  { %1151 = vmatpush1.bf16.msra.mxu0 %v2781_v18  ;;  %1233 = vmatpush1.bf16.msra.mxu1 %v2784_v19  ;;  %v2867_v18 = vld [vmem:[#allocation9 + $0xe4] ss:$16 sps:$4 sm:$0xff]   ;;  %v2870_v19 = vld [vmem:[#allocation9 + $0xec] ss:$16 sps:$4 sm:$0xff]  }
 0x15d   :  { %1152 = vmatprep.subr.bf16.mxu0 %v2789_v25  ;;  %1234 = vmatprep.subr.bf16.mxu1 %v2792_v26  ;;  %v2865_v25 = vld [vmem:[#allocation9 + $0xe0] ss:$16 sps:$4 sm:$0xff]   ;;  %v2868_v26 = vld [vmem:[#allocation9 + $0xe8] ss:$16 sps:$4 sm:$0xff]  }
 0x160   :  { %1153 = vmatpush1.bf16.msra.mxu0 %v2787_v27  ;;  %1235 = vmatpush1.bf16.msra.mxu1 %v2790_v29  ;;  %v2873_v27 = vld [vmem:[#allocation9 + $0x104] ss:$16 sps:$4 sm:$0xff]   ;;  %v2876_v29 = vld [vmem:[#allocation9 + $0x10c] ss:$16 sps:$4 sm:$0xff]  }
 0x161   :  { %1154 = vmatprep.subr.bf16.mxu0 %v2795_v30  ;;  %1236 = vmatprep.subr.bf16.mxu1 %v2798_v31  ;;  %v2871_v30 = vld [vmem:[#allocation9 + $0x100] ss:$16 sps:$4 sm:$0xff]   ;;  %v2874_v31 = vld [vmem:[#allocation9 + $0x108] ss:$16 sps:$4 sm:$0xff]  }
 0x164   :  { %1155 = vmatpush1.bf16.msra.mxu0 %v2793_v32  ;;  %1237 = vmatpush1.bf16.msra.mxu1 %v2796_v33  ;;  %v2879_v32 = vld [vmem:[#allocation9 + $0x124] ss:$16 sps:$4 sm:$0xff]   ;;  %v2882_v33 = vld [vmem:[#allocation9 + $0x12c] ss:$16 sps:$4 sm:$0xff]  }
 0x165   :  { %1156 = vmatprep.subr.bf16.mxu0 %v2801_v34  ;;  %1238 = vmatprep.subr.bf16.mxu1 %v2804_v35  ;;  %v2877_v34 = vld [vmem:[#allocation9 + $0x120] ss:$16 sps:$4 sm:$0xff]   ;;  %v2880_v35 = vld [vmem:[#allocation9 + $0x128] ss:$16 sps:$4 sm:$0xff]  }
 0x168   :  { %1157 = vmatpush1.bf16.msra.mxu0 %v2799_v36  ;;  %1239 = vmatpush1.bf16.msra.mxu1 %v2802_v37  ;;  %v2885_v36 = vld [vmem:[#allocation9 + $0x144] ss:$16 sps:$4 sm:$0xff]   ;;  %v2888_v37 = vld [vmem:[#allocation9 + $0x14c] ss:$16 sps:$4 sm:$0xff]  }
 0x169   :  { %1158 = vmatprep.subr.bf16.mxu0 %v2807_v39  ;;  %1240 = vmatprep.subr.bf16.mxu1 %v2810_v41  ;;  %v2883_v39 = vld [vmem:[#allocation9 + $0x140] ss:$16 sps:$4 sm:$0xff]   ;;  %v2886_v41 = vld [vmem:[#allocation9 + $0x148] ss:$16 sps:$4 sm:$0xff]  }
 0x16c   :  { %1159 = vmatpush1.bf16.msra.mxu0 %v2805_v42  ;;  %1241 = vmatpush1.bf16.msra.mxu1 %v2808_v43  ;;  %v2891_v42 = vld [vmem:[#allocation9 + $0x164] ss:$16 sps:$4 sm:$0xff]   ;;  %v2894_v43 = vld [vmem:[#allocation9 + $0x16c] ss:$16 sps:$4 sm:$0xff]  }
 0x16d   :  { %1160 = vmatprep.subr.bf16.mxu0 %v2813_v45  ;;  %1242 = vmatprep.subr.bf16.mxu1 %v2816_v46  ;;  %v2892_v45 = vld [vmem:[#allocation9 + $0x168] ss:$16 sps:$4 sm:$0xff]   ;;  %v2897_v46 = vld [vmem:[#allocation9 + $0x184] ss:$16 sps:$4 sm:$0xff]  }
 0x170   :  { %1161 = vmatpush1.bf16.msra.mxu0 %v2811_v47  ;;  %1243 = vmatpush1.bf16.msra.mxu1 %v2814_v48  ;;  %v2900_v47 = vld [vmem:[#allocation9 + $0x18c] ss:$16 sps:$4 sm:$0xff]   ;;  %v2895_v48 = vld [vmem:[#allocation9 + $0x180] ss:$16 sps:$4 sm:$0xff]  }
 0x171   :  { %1162 = vmatprep.subr.bf16.mxu0 %v2819_v50  ;;  %1244 = vmatprep.subr.bf16.mxu1 %v2822_v51  ;;  %v2903_v50 = vld [vmem:[#allocation9 + $0x1a4] ss:$16 sps:$4 sm:$0xff]   ;;  %v2906_v51 = vld [vmem:[#allocation9 + $0x1ac] ss:$16 sps:$4 sm:$0xff]  }
 0x174   :  { %1163 = vmatpush1.bf16.msra.mxu0 %v2817_v52  ;;  %1245 = vmatpush1.bf16.msra.mxu1 %v2820_v53  ;;  %v2901_v52 = vld [vmem:[#allocation9 + $0x1a0] ss:$16 sps:$4 sm:$0xff]   ;;  %v2904_v53 = vld [vmem:[#allocation9 + $0x1a8] ss:$16 sps:$4 sm:$0xff]  }
 0x175   :  { %2053 = vmatprep.subr.bf16.mxu0 %v2825_v23  ;;  %2135 = vmatprep.subr.bf16.mxu1 %v2828_v55  ;;  %v2912_v23 = vld [vmem:[#allocation9 + $0x1cc] ss:$16 sps:$4 sm:$0xff]   ;;  %v2907_v55 = vld [vmem:[#allocation9 + $0x1c0] ss:$16 sps:$4 sm:$0xff]  }
 0x177   :  { %1165 = vmatmul.mubr.bf16.vlgmr.msra.gmra.mrb[4].mxu0 %v299_v58  ;;  %1247 = vmatmul.mubr.bf16.vlgmr.msra.gmra.mrb[4].mxu1 %v299_v58  ;;  %v2918_v58 = vld [vmem:[#allocation9 + $0x1ec] ss:$16 sps:$4 sm:$0xff]  }
 0x178   :  { %2054 = vmatpush1.bf16.msra.mxu0 %v2823_v56  ;;  %2136 = vmatpush1.bf16.msra.mxu1 %v2826_v57  ;;  %v2910_v56 = vld [vmem:[#allocation9 + $0x1c8] ss:$16 sps:$4 sm:$0xff]   ;;  %v2915_v57 = vld [vmem:[#allocation9 + $0x1e4] ss:$16 sps:$4 sm:$0xff]  }
 0x179   :  { %2055 = vmatprep.subr.bf16.mxu0 %v2831_v40  ;;  %2137 = vmatprep.subr.bf16.mxu1 %v2834_v59  ;;  %v2913_v40 = vld [vmem:[#allocation9 + $0x1e0] ss:$16 sps:$4 sm:$0xff]   ;;  %v2916_v59 = vld [vmem:[#allocation9 + $0x1e8] ss:$16 sps:$4 sm:$0xff]  }
 0x17c   :  { %2056 = vmatpush1.bf16.msra.mxu0 %v2829_v60  ;;  %2138 = vmatpush1.bf16.msra.mxu1 %v2832_v61  ;;  %v2921_v60 = vld [vmem:[#allocation9 + $0x204] ss:$16 sps:$4 sm:$0xff]   ;;  %v2924_v61 = vld [vmem:[#allocation9 + $0x20c] ss:$16 sps:$4 sm:$0xff]  }
 0x17d   :  { %2057 = vmatprep.subr.bf16.mxu0 %v2837_v62  ;;  %2139 = vmatprep.subr.bf16.mxu1 %v2840_v63  ;;  %v3288_v62 = vld [vmem:[%s3339_s4] sm:$0xf] }
 0x17e   :  { %v434_v63 = vrot.slane %v3288_v62, %v3258_v22 }
 0x180   :  { %2058 = vmatpush1.bf16.msra.mxu0 %v2835_v0  ;;  %2140 = vmatpush1.bf16.msra.mxu1 %v2838_v1  ;;  %v438_v0 = vrot.slane %v3288_v62, %v3266_v24  ;;  %v446_v1 = vrot.slane %v3288_v62, %v3273_v28 }
 0x181   :  { %2059 = vmatprep.subr.bf16.mxu0 %v2843_v2  ;;  %2141 = vmatprep.subr.bf16.mxu1 %v2846_v3 }
 0x184   :  { %2060 = vmatpush1.bf16.msra.mxu0 %v2841_v4  ;;  %2142 = vmatpush1.bf16.msra.mxu1 %v2844_v5 }
 0x185   :  { %2061 = vmatprep.subr.bf16.mxu0 %v2849_v6  ;;  %2143 = vmatprep.subr.bf16.mxu1 %v2852_v7 }
 0x188   :  { %2062 = vmatpush1.bf16.msra.mxu0 %v2847_v8  ;;  %2144 = vmatpush1.bf16.msra.mxu1 %v2850_v9 }
 0x189   :  { %2063 = vmatprep.subr.bf16.mxu0 %v2855_v10  ;;  %2145 = vmatprep.subr.bf16.mxu1 %v2858_v11 }
 0x18c   :  { %2064 = vmatpush1.bf16.msra.mxu0 %v2853_v12  ;;  %2146 = vmatpush1.bf16.msra.mxu1 %v2856_v13 }
 0x18d   :  { %2065 = vmatprep.subr.bf16.mxu0 %v2861_v14  ;;  %2147 = vmatprep.subr.bf16.mxu1 %v2864_v15 }
 0x190   :  { %2066 = vmatpush1.bf16.msra.mxu0 %v2859_v16  ;;  %2148 = vmatpush1.bf16.msra.mxu1 %v2862_v17  ;;  %v2919_v17 = vld [vmem:[#allocation9 + $0x200] ss:$16 sps:$4 sm:$0xff]  }
 0x191   :  { %2067 = vmatprep.subr.bf16.mxu0 %v2867_v18  ;;  %2149 = vmatprep.subr.bf16.mxu1 %v2870_v19  ;;  %v2922_v18 = vld [vmem:[#allocation9 + $0x208] ss:$16 sps:$4 sm:$0xff]  }
 0x194   :  { %2068 = vmatpush1.bf16.msra.mxu0 %v2865_v25  ;;  %2150 = vmatpush1.bf16.msra.mxu1 %v2868_v26  ;;  %v2927_v25 = vld [vmem:[#allocation9 + $0x224] ss:$16 sps:$4 sm:$0xff]   ;;  %v2930_v26 = vld [vmem:[#allocation9 + $0x22c] ss:$16 sps:$4 sm:$0xff]  }
 0x195   :  { %2069 = vmatprep.subr.bf16.mxu0 %v2873_v27  ;;  %2151 = vmatprep.subr.bf16.mxu1 %v2876_v29  ;;  %v2925_v29 = vld [vmem:[#allocation9 + $0x220] ss:$16 sps:$4 sm:$0xff]  }
 0x198   :  { %2070 = vmatpush1.bf16.msra.mxu0 %v2871_v30  ;;  %2152 = vmatpush1.bf16.msra.mxu1 %v2874_v31  ;;  %v2928_v30 = vld [vmem:[#allocation9 + $0x228] ss:$16 sps:$4 sm:$0xff]   ;;  %v2933_v31 = vld [vmem:[#allocation9 + $0x244] ss:$16 sps:$4 sm:$0xff]  }
 0x199   :  { %2071 = vmatprep.subr.bf16.mxu0 %v2879_v32  ;;  %2153 = vmatprep.subr.bf16.mxu1 %v2882_v33  ;;  %v2936_v32 = vld [vmem:[#allocation9 + $0x24c] ss:$16 sps:$4 sm:$0xff]   ;;  %v2931_v33 = vld [vmem:[#allocation9 + $0x240] ss:$16 sps:$4 sm:$0xff]  }
 0x19c   :  { %2072 = vmatpush1.bf16.msra.mxu0 %v2877_v34  ;;  %2154 = vmatpush1.bf16.msra.mxu1 %v2880_v35  ;;  %v2934_v34 = vld [vmem:[#allocation9 + $0x248] ss:$16 sps:$4 sm:$0xff]   ;;  %v2939_v35 = vld [vmem:[#allocation9 + $0x264] ss:$16 sps:$4 sm:$0xff]  }
 0x19d   :  { %2073 = vmatprep.subr.bf16.mxu0 %v2885_v36  ;;  %2155 = vmatprep.subr.bf16.mxu1 %v2888_v37  ;;  %v2942_v36 = vld [vmem:[#allocation9 + $0x26c] ss:$16 sps:$4 sm:$0xff]   ;;  %v2937_v37 = vld [vmem:[#allocation9 + $0x260] ss:$16 sps:$4 sm:$0xff]  }
 0x1a0   :  { %2074 = vmatpush1.bf16.msra.mxu0 %v2883_v39  ;;  %2156 = vmatpush1.bf16.msra.mxu1 %v2886_v41  ;;  %v2940_v39 = vld [vmem:[#allocation9 + $0x268] ss:$16 sps:$4 sm:$0xff]   ;;  %v2945_v41 = vld [vmem:[#allocation9 + $0x284] ss:$16 sps:$4 sm:$0xff]  }
 0x1a1   :  { %2075 = vmatprep.subr.bf16.mxu0 %v2891_v42  ;;  %2157 = vmatprep.subr.bf16.mxu1 %v2894_v43  ;;  %v2948_v42 = vld [vmem:[#allocation9 + $0x28c] ss:$16 sps:$4 sm:$0xff]   ;;  %v2943_v43 = vld [vmem:[#allocation9 + $0x280] ss:$16 sps:$4 sm:$0xff]  }
 0x1a4   :  { %2076 = vmatpush1.bf16.msra.mxu0 %v2889_v44  ;;  %2158 = vmatpush1.bf16.msra.mxu1 %v2892_v45  ;;  %v2946_v44 = vld [vmem:[#allocation9 + $0x288] ss:$16 sps:$4 sm:$0xff]   ;;  %v2951_v45 = vld [vmem:[#allocation9 + $0x2a4] ss:$16 sps:$4 sm:$0xff]  }
 0x1a5   :  { %2077 = vmatprep.subr.bf16.mxu0 %v2897_v46  ;;  %2159 = vmatprep.subr.bf16.mxu1 %v2900_v47  ;;  %v2954_v46 = vld [vmem:[#allocation9 + $0x2ac] ss:$16 sps:$4 sm:$0xff]   ;;  %v2949_v47 = vld [vmem:[#allocation9 + $0x2a0] ss:$16 sps:$4 sm:$0xff]  }
 0x1a8   :  { %2078 = vmatpush1.bf16.msra.mxu0 %v2895_v48  ;;  %2160 = vmatpush1.bf16.msra.mxu1 %v2898_v49  ;;  %v2952_v48 = vld [vmem:[#allocation9 + $0x2a8] ss:$16 sps:$4 sm:$0xff]   ;;  %v2957_v49 = vld [vmem:[#allocation9 + $0x2c4] ss:$16 sps:$4 sm:$0xff]  }
 0x1a9   :  { %2079 = vmatprep.subr.bf16.mxu0 %v2903_v50  ;;  %2161 = vmatprep.subr.bf16.mxu1 %v2906_v51  ;;  %v2960_v50 = vld [vmem:[#allocation9 + $0x2cc] ss:$16 sps:$4 sm:$0xff]   ;;  %v2955_v51 = vld [vmem:[#allocation9 + $0x2c0] ss:$16 sps:$4 sm:$0xff]  }
 0x1ac   :  { %2080 = vmatpush1.bf16.msra.mxu0 %v2901_v52  ;;  %2162 = vmatpush1.bf16.msra.mxu1 %v2904_v53  ;;  %v2958_v52 = vld [vmem:[#allocation9 + $0x2c8] ss:$16 sps:$4 sm:$0xff]   ;;  %v2963_v53 = vld [vmem:[#allocation9 + $0x2e4] ss:$16 sps:$4 sm:$0xff]  }
 0x1ad   :  { %2081 = vmatprep.subr.bf16.mxu0 %v2909_v54  ;;  %2163 = vmatprep.subr.bf16.mxu1 %v2912_v23  ;;  %v2966_v54 = vld [vmem:[#allocation9 + $0x2ec] ss:$16 sps:$4 sm:$0xff]   ;;  %v2961_v23 = vld [vmem:[#allocation9 + $0x2e0] ss:$16 sps:$4 sm:$0xff]  }
 0x1b0   :  { %2082 = vmatpush1.bf16.msra.mxu0 %v2907_v55  ;;  %2164 = vmatpush1.bf16.msra.mxu1 %v2910_v56  ;;  %v2964_v55 = vld [vmem:[#allocation9 + $0x2e8] ss:$16 sps:$4 sm:$0xff]   ;;  %v2969_v56 = vld [vmem:[#allocation9 + $0x304] ss:$16 sps:$4 sm:$0xff]  }
 0x1b1   :  { %2083 = vmatprep.subr.bf16.mxu0 %v2915_v57  ;;  %2165 = vmatprep.subr.bf16.mxu1 %v2918_v58  ;;  %v2972_v57 = vld [vmem:[#allocation9 + $0x30c] ss:$16 sps:$4 sm:$0xff]   ;;  %v2967_v58 = vld [vmem:[#allocation9 + $0x300] ss:$16 sps:$4 sm:$0xff]  }
 0x1b4   :  { %2084 = vmatpush1.bf16.msra.mxu0 %v2913_v40  ;;  %2166 = vmatpush1.bf16.msra.mxu1 %v2916_v59  ;;  %v2970_v40 = vld [vmem:[#allocation9 + $0x308] ss:$16 sps:$4 sm:$0xff]   ;;  %v2975_v59 = vld [vmem:[#allocation9 + $0x324] ss:$16 sps:$4 sm:$0xff]  }
 0x1b5   :  { %2094 = vmatprep.subr.bf16.mxu0 %v2921_v60  ;;  %2176 = vmatprep.subr.bf16.mxu1 %v2924_v61  ;;  %v2978_v60 = vld [vmem:[#allocation9 + $0x32c] ss:$16 sps:$4 sm:$0xff]   ;;  %v2973_v61 = vld [vmem:[#allocation9 + $0x320] ss:$16 sps:$4 sm:$0xff]  }
 0x24a   :  { %v1166_v2 = vpop.f32.mrb[4].mxu0  ;;  %v3296_v3 = vpop.f32.mrb[4].mxu1 }
 0x24b   :  { %v2575_v4 = vadd.f32 %v1166_v2, %v434_v63  ;;  %v1168_v5 = vpop.f32.mrb[5].mxu0  ;;  %v1250_v6 = vpop.f32.mrb[5].mxu1  ;;  %v2976_v63 = vld [vmem:[#allocation9 + $0x328] ss:$16 sps:$4 sm:$0xff]   ;;  %v2979_v2 = vld [vmem:[#allocation9 + $0x340] ss:$16 sps:$4 sm:$0xff]  }
 0x24c   :  { %v2576_v7 = vadd.f32 %v1168_v5, %v438_v0  ;;  %v2578_v8 = vadd.f32 %v1250_v6, %v446_v1  ;;  %v1170_v9 = vpop.f32.mrb[6].mxu0  ;;  %v1252_v10 = vpop.f32.mrb[6].mxu1  ;;  %v2981_v0 = vld [vmem:[#allocation9 + $0x344] ss:$16 sps:$4 sm:$0xff]   ;;  %v2984_v1 = vld [vmem:[#allocation9 + $0x34c] ss:$16 sps:$4 sm:$0xff]  }
 0x24d   :  { %v1255_v11 = vmax.f32 %v2575_v4, 0.0  ;;  %v1171_v12 = vpop.f32.mrb[7].mxu0  ;;  %v1253_v13 = vpop.f32.mrb[7].mxu1  ;;  %v2982_v4 = vld [vmem:[#allocation9 + $0x348] ss:$16 sps:$4 sm:$0xff]  }
 0x24e   :  { %v1256_v14 = vmax.f32 %v2576_v7, 0.0  ;;  %v1258_v15 = vmax.f32 %v2578_v8, 0.0  ;;  %v2987_v5 = vld [vmem:[#allocation9 + $0x364] ss:$16 sps:$4 sm:$0xff]   ;;  %v2990_v6 = vld [vmem:[#allocation9 + $0x36c] ss:$16 sps:$4 sm:$0xff]  }
 0x24f   :  { %v1259_v19 = vpack.c.bf16 %v1255_v11, %v1255_v11  ;;  %v2985_v7 = vld [vmem:[#allocation9 + $0x360] ss:$16 sps:$4 sm:$0xff]   ;;  %v2988_v8 = vld [vmem:[#allocation9 + $0x368] ss:$16 sps:$4 sm:$0xff]   ;;  %v2993_v9 = vld [vmem:[#allocation9 + $0x384] ss:$16 sps:$4 sm:$0xff]  }
 0x250   :  { %v1260_v16 = vpack.c.bf16 %v1256_v14, %v1256_v14  ;;  %v1262_v27 = vpack.c.bf16 %v1258_v15, %v1258_v15  ;;  %v2996_v10 = vld [vmem:[#allocation9 + $0x38c] ss:$16 sps:$4 sm:$0xff]   ;;  %v2991_v11 = vld [vmem:[#allocation9 + $0x380] ss:$16 sps:$4 sm:$0xff]   ;;  %v2994_v12 = vld [vmem:[#allocation9 + $0x388] ss:$16 sps:$4 sm:$0xff]  }
 0x251   :  { %v2999_v13 = vld [vmem:[#allocation9 + $0x3a4] ss:$16 sps:$4 sm:$0xff]   ;;  %v3002_v14 = vld [vmem:[#allocation9 + $0x3ac] ss:$16 sps:$4 sm:$0xff]   ;;  %v2997_v15 = vld [vmem:[#allocation9 + $0x3a0] ss:$16 sps:$4 sm:$0xff]  }
 0x252   :  { %2085 = vmatprep.mubr.bf16.mxu0 %v1260_v16  ;;  %2167 = vmatprep.mubr.bf16.mxu1 %v1260_v16  ;;  %v3000_v16 = vld [vmem:[#allocation9 + $0x3a8] ss:$16 sps:$4 sm:$0xff]  }
 0x253   :  { %2086 = vmatmul.mubr.bf16.vlgmr.msra.gmra.mrb[8].mxu0 %v1259_v19  ;;  %2168 = vmatmul.mubr.bf16.vlgmr.msra.gmra.mrb[8].mxu1 %v1259_v19  ;;  %v3008_v19 = vld [vmem:[#allocation9 + $0x3cc] ss:$16 sps:$4 sm:$0xff]  }
 0x254   :  { %2095 = vmatpush1.bf16.msra.mxu0 %v2919_v17  ;;  %2177 = vmatpush1.bf16.msra.mxu1 %v2922_v18  ;;  %v442_v17 = vrot.slane %v3288_v62, %v3280_v38  ;;  %v3005_v18 = vld [vmem:[#allocation9 + $0x3c4] ss:$16 sps:$4 sm:$0xff]  }
 0x255   :  { %2126 = vmatprep.mubr.bf16.mxu0 %v1262_v27  ;;  %2208 = vmatprep.mubr.bf16.mxu1 %v1262_v27 }
 0x256   :  { %2096 = vmatprep.subr.bf16.mxu0 %v2927_v25  ;;  %2178 = vmatprep.subr.bf16.mxu1 %v2930_v26  ;;  %v3003_v25 = vld [vmem:[#allocation9 + $0x3c0] ss:$16 sps:$4 sm:$0xff]   ;;  %v3006_v26 = vld [vmem:[#allocation9 + $0x3c8] ss:$16 sps:$4 sm:$0xff]   ;;  %v2577_v27 = vadd.f32 %v3296_v3, %v442_v17  ;;  %v2221_v3 = vld [vmem:[%s3342_s7] sm:$0xf] }
 0x258   :  { %2097 = vmatpush1.bf16.msra.mxu0 %v2925_v29  ;;  %2179 = vmatpush1.bf16.msra.mxu1 %v2928_v30  ;;  %v3011_v29 = vld [vmem:[#allocation9 + $0x3e4] ss:$16 sps:$4 sm:$0xff]   ;;  %v3014_v30 = vld [vmem:[#allocation9 + $0x3ec] ss:$16 sps:$4 sm:$0xff]  }
 0x259   :  { %2098 = vmatprep.subr.bf16.mxu0 %v2933_v31  ;;  %2180 = vmatprep.subr.bf16.mxu1 %v2936_v32  ;;  %v3009_v31 = vld [vmem:[#allocation9 + $0x3e0] ss:$16 sps:$4 sm:$0xff]   ;;  %v3012_v32 = vld [vmem:[#allocation9 + $0x3e8] ss:$16 sps:$4 sm:$0xff]  }
 0x25c   :  { %2099 = vmatpush1.bf16.msra.mxu0 %v2931_v33  ;;  %2181 = vmatpush1.bf16.msra.mxu1 %v2934_v34  ;;  %v1257_v33 = vmax.f32 %v2577_v27, 0.0  ;;  %v2222_v34 = vunpack.c.l.bf16 %v2221_v3 }
 0x25d   :  { %2100 = vmatprep.subr.bf16.mxu0 %v2939_v35  ;;  %2182 = vmatprep.subr.bf16.mxu1 %v2942_v36  ;;  %v1391_v35 = vld [vmem:[%s3341_s6] sm:$0xf]  ;;  %v2234_v36 = vsub.s32 4, %v3255_v21 }
 0x25e   :  { %v1261_v62 = vpack.c.bf16 %v1257_v33, %v1257_v33 }
 0x260   :  { %2101 = vmatpush1.bf16.msra.mxu0 %v2937_v37  ;;  %2183 = vmatpush1.bf16.msra.mxu1 %v2940_v39  ;;  %v1396_v37 = vrot.slane %v1391_v35, %v3258_v22  ;;  %v2227_v39 = vrot.slane %v2222_v34, %v3258_v22 }
 0x261   :  { %2102 = vmatprep.subr.bf16.mxu0 %v2945_v41  ;;  %2184 = vmatprep.subr.bf16.mxu1 %v2948_v42  ;;  %v1404_v41 = vrot.slane %v1391_v35, %v3280_v38  ;;  %v1400_v42 = vrot.slane %v1391_v35, %v3266_v24 }
 0x264   :  { %2103 = vmatpush1.bf16.msra.mxu0 %v2943_v43  ;;  %2185 = vmatpush1.bf16.msra.mxu1 %v2946_v44  ;;  %v2231_v43 = vrot.slane %v2222_v34, %v3280_v38  ;;  %v1408_v44 = vrot.slane %v1391_v35, %v3273_v28 }
 0x265   :  { %2104 = vmatprep.subr.bf16.mxu0 %v2951_v45  ;;  %2186 = vmatprep.subr.bf16.mxu1 %v2954_v46  ;;  %v2238_v45 = vsub.s32 6, %v3255_v21 }
 0x267   :  { %v2239_v38 = vrot.slane %v2222_v34, %v2238_v45 }
 0x268   :  { %2105 = vmatpush1.bf16.msra.mxu0 %v2949_v47  ;;  %2187 = vmatpush1.bf16.msra.mxu1 %v2952_v48  ;;  %v2235_v48 = vrot.slane %v2222_v34, %v2234_v36 }
 0x269   :  { %2106 = vmatprep.subr.bf16.mxu0 %v2957_v49  ;;  %2188 = vmatprep.subr.bf16.mxu1 %v2960_v50  ;;  %v2247_v50 = vrot.slane %v2227_v39, %v3258_v22 }
 0x26c   :  { %2107 = vmatpush1.bf16.msra.mxu0 %v2955_v51  ;;  %2189 = vmatpush1.bf16.msra.mxu1 %v2958_v52 }
 0x26d   :  { %2108 = vmatprep.subr.bf16.mxu0 %v2963_v53  ;;  %2190 = vmatprep.subr.bf16.mxu1 %v2966_v54 }
 0x270   :  { %2109 = vmatpush1.bf16.msra.mxu0 %v2961_v23  ;;  %2191 = vmatpush1.bf16.msra.mxu1 %v2964_v55  ;;  %v2251_v23 = vrot.slane %v2231_v43, %v3258_v22 }
 0x271   :  { %2110 = vmatprep.subr.bf16.mxu0 %v2969_v56  ;;  %2192 = vmatprep.subr.bf16.mxu1 %v2972_v57 }
 0x274   :  { %2111 = vmatpush1.bf16.msra.mxu0 %v2967_v58  ;;  %2193 = vmatpush1.bf16.msra.mxu1 %v2970_v40  ;;  %v2255_v40 = vrot.slane %v2235_v48, %v3258_v22 }
 0x275   :  { %2112 = vmatprep.subr.bf16.mxu0 %v2975_v59  ;;  %2194 = vmatprep.subr.bf16.mxu1 %v2978_v60 }
 0x278   :  { %2113 = vmatpush1.bf16.msra.mxu0 %v2973_v61  ;;  %2195 = vmatpush1.bf16.msra.mxu1 %v2976_v63 }
 0x279   :  { %2114 = vmatprep.subr.bf16.mxu0 %v2981_v0  ;;  %2196 = vmatprep.subr.bf16.mxu1 %v2984_v1  ;;  %v2259_v0 = vrot.slane %v2239_v38, %v3258_v22 }
 0x27c   :  { %2115 = vmatpush1.bf16.msra.mxu0 %v2979_v2  ;;  %2197 = vmatpush1.bf16.msra.mxu1 %v2982_v4 }
 0x27d   :  { %2116 = vmatprep.subr.bf16.mxu0 %v2987_v5  ;;  %2198 = vmatprep.subr.bf16.mxu1 %v2990_v6 }
 0x280   :  { %2117 = vmatpush1.bf16.msra.mxu0 %v2985_v7  ;;  %2199 = vmatpush1.bf16.msra.mxu1 %v2988_v8  ;;  %v2270_v7 = vstv %s3343_s8 }
 0x281   :  { %2118 = vmatprep.subr.bf16.mxu0 %v2993_v9  ;;  %2200 = vmatprep.subr.bf16.mxu1 %v2996_v10 }
 0x284   :  { %2119 = vmatpush1.bf16.msra.mxu0 %v2991_v11  ;;  %2201 = vmatpush1.bf16.msra.mxu1 %v2994_v12 }
 0x285   :  { %2120 = vmatprep.subr.bf16.mxu0 %v2999_v13  ;;  %2202 = vmatprep.subr.bf16.mxu1 %v3002_v14  ;;  %v2279_v13 = vand.u32 127, %v107_v20 }
 0x287   :  { %vm2280_vm1 = vcmp.eq.s32.totalorder %v2279_v13, 0 }
 0x288   :  { %2121 = vmatpush1.bf16.msra.mxu0 %v2997_v15  ;;  %2203 = vmatpush1.bf16.msra.mxu1 %v3000_v16 }
 0x289   :  { %2122 = vmatprep.subr.bf16.mxu0 %v3005_v18  ;;  %2204 = vmatprep.subr.bf16.mxu1 %v3008_v19 }
 0x28c   :  { %2123 = vmatpush1.bf16.msra.mxu0 %v3003_v25  ;;  %2205 = vmatpush1.bf16.msra.mxu1 %v3006_v26 }
 0x28d   :  { %2124 = vmatprep.subr.bf16.mxu0 %v3011_v29  ;;  %2206 = vmatprep.subr.bf16.mxu1 %v3014_v30 }
 0x290   :  { %2125 = vmatpush1.bf16.msra.mxu0 %v3009_v31  ;;  %2207 = vmatpush1.bf16.msra.mxu1 %v3012_v32 }
 0x293   :  { %2127 = vmatmul.mubr.bf16.vlgmr.msra.gmra.mrb[8].mxu0 %v1261_v62  ;;  %2209 = vmatmul.mubr.bf16.vlgmr.msra.gmra.mrb[8].mxu1 %v1261_v62 }
 0x366   :  { %v2128_v46 = vpop.f32.mrb[8].mxu0  ;;  %v2210_v47 = vpop.f32.mrb[8].mxu1 }
 0x367   :  { %v2579_v49 = vadd.f32 %v2128_v46, %v1396_v37  ;;  %v2581_v51 = vadd.f32 %v2210_v47, %v1404_v41  ;;  %v2130_v52 = vpop.f32.mrb[9].mxu0  ;;  %v2212_v53 = vpop.f32.mrb[9].mxu1 }
 0x368   :  { %v2580_v54 = vadd.f32 %v2130_v52, %v1400_v42  ;;  %v2582_v55 = vadd.f32 %v2212_v53, %v1408_v44  ;;  %v2132_v24 = vpop.f32.mrb[10].mxu0  ;;  %v2214_v56 = vpop.f32.mrb[10].mxu1 }
 0x369   :  { %v2217_v57 = vmax.f32 %v2579_v49, 0.0  ;;  %v2133_v28 = vpop.f32.mrb[11].mxu0  ;;  %v2215_v58 = vpop.f32.mrb[11].mxu1  ;;  %v2219_v21 = vmax.f32 %v2581_v51, 0.0 }
 0x36a   :  { %v2218_v59 = vmax.f32 %v2580_v54, 0.0  ;;  %v2220_v63 = vmax.f32 %v2582_v55, 0.0 }
 0x36b   :  { %v2260_v60 = vmul.f32 %v2247_v50, %v2217_v57  ;;  %v2262_v1 = vmul.f32 %v2255_v40, %v2219_v21 }
 0x36c   :  { %v2261_v61 = vmul.f32 %v2251_v23, %v2218_v59  ;;  %v2263_v4 = vmul.f32 %v2259_v0, %v2220_v63 }
 0x36e   :  { %v2264_v2 = vadd.f32 %v2261_v61, %v2260_v60 }
 0x370   :  { %v2265_v5 = vadd.f32 %v2264_v2, %v2262_v1 }
 0x372   :  { %v2266_v6 = vadd.f32 %v2265_v5, %v2263_v4 }
 0x374   :  { %2267 = vadd.xlane.f32.xlu0 %v2266_v6 }
 0x401   :  { %v2268_v8 = vpop.xlane.xlu0 %2267 }
 0x402   :  { %v2271_v9 = vadd.f32 %v2270_v7, %v2268_v8 }
 0x404   :  { %v2574_v10 = vmul.f32 -1.442695, %v2271_v9 }
 0x406   :  { %3015 = vpow2.f32 %v2574_v10 }
 0x410   :  { %v3016_v11 = vpop.eup %3015 }
 0x411   :  { %v2275_v12 = vadd.f32 1.0, %v3016_v11 }
 0x413   :  { %3017 = vrcp.f32 %v2275_v12 }
 0x41d   :  { %v3018_v22 = vpop.eup %3017 }
 0x41e   :  { %v2281_v14 = vsel %vm2280_vm1, %v2271_v9, %v3018_v22 }
 0x41f   :  { %2282 = vst [vmem:[#allocation11] sm:$0xff] %v2281_v14 }
 0x420   :  { %3118 = shalt.err (!%p3115_p8)
}
 0x421   :  { %s3119_s25 = scalar_lea.hbm %s3344_s9, 128 }
 0x422   :  { %p3120_p9 = scmp.ne.s32.totalorder %s3344_s9, %s3119_s25  ;;  %p3123_p10 = scmp.lt.u32.totalorder %s3119_s25, %s3344_s9 }
 0x424   :  { %p3125_p11 = pnand %p3123_p10, %p3120_p9 }
 0x426   :  { %3128 = shalt.err (!%p3125_p11)
}
 0x427   :  { %2292 = dma.vmem_to_hbm [thread:$0]  %s2290_s21, 128, %s3344_s9, [#allocation5]  }
 0x428   :  { %3135 = dma.done.wait [#allocation5], 128  }
 0x429   :  { %3136 = vsyncadd [#allocation5], 4294967168 }
 0x42a   :  { %2296 = vsyncpa [#allocation4], 1 }
 0x42b   :  { %2297 = vsyncpa [#allocation7], 1 }
 0x42c   :  { %2298 = vsyncpa [#allocation10], 1 }
 0x42d   :  { %2299 = vsyncpa [#allocation5], 1 }

</bundles_post_ra>
